<compile_context>
chip_gen: v7x
topology: tpu7x:2x2x1
jax: 0.10.0
libtpu: 0.0.40
codegen_flags: <defaults>
</compile_context>

<pallas_src>
import functools

import jax
import jax.numpy as jnp
from jax.experimental import pallas as pl
from jax.experimental.pallas import tpu as pltpu


def _conv3x3_folded_bn(xpad, w_ref, bias, *, H, W, Cout, apply_relu):
    """3x3 SAME conv + folded-BN bias (+ optional ReLU) for one image.

    xpad : (H+2, W+2, Cin) f32 value; zero halo, data in [1:H+1, 1:W+1].
    w_ref: (3, 3*Cin, Cout) ref; axis 0 = dy tap, K axis = (dx, Cin) flattened,
           BN scale already folded into the weights.
    bias : (1, Cout) folded BN bias.
    Returns (H, W, Cout) f32.
    """
    Cin = xpad.shape[-1]

    # Hoist the width (sublane-axis) shifts out of the tap loop: three column
    # windows (only dx=1,2 are misaligned), stacked on the lane axis so each dy
    # row does a single MXU matmul with K = 3*Cin instead of three K = Cin dots.
    cols = [xpad[:, dx:dx + W, :] for dx in range(3)]          # (H+2, W, Cin) each
    patches = jnp.concatenate(cols, axis=-1)                   # (H+2, W, 3*Cin)

    acc = jnp.zeros((H * W, Cout), dtype=jnp.float32)
    for dy in range(3):                                        # unrolled (3 taps)
        # dim-0 slice is free (non-vreg dim); reshape is layout-preserving for
        # W a multiple of 8 and 3*Cin <= 128.
        p = patches[dy:dy + H, :, :].reshape(H * W, 3 * Cin)
        acc = acc + jnp.dot(p, w_ref[dy].astype(jnp.float32),
                            preferred_element_type=jnp.float32)

    y = acc + bias.astype(jnp.float32)                         # (H*W, Cout)+(1, Cout)
    if apply_relu:
        y = jnp.maximum(y, 0.0)
    return y.reshape(H, W, Cout)


def _double_cbr_kernel(x_ref, w1_ref, b1_ref, w2_ref, b2_ref, o_ref,
                       xpad_ref, ypad_ref, *, H, W, Cin, Cmid, Cout):
    """One batch element per grid step; both conv+BN stages fused.

    x_ref:  (1, H, W, Cin)            input block (no HBM-side padding)
    w1_ref: (3, 3*Cin, Cmid)          stage-1 weights, BN1 scale folded in
    b1_ref: (1, Cmid)                 stage-1 folded BN bias
    w2_ref: (3, 3*Cmid, Cout)         stage-2 weights, BN2 scale folded in
    b2_ref: (1, Cout)                 stage-2 folded BN bias
    o_ref:  (1, H, W, Cout)           final output block
    xpad_ref: VMEM (H+2, W+2, Cin)    zero-haloed stage-1 input scratch
    ypad_ref: VMEM (H+2, W+2, Cmid)   zero-haloed stage-2 input scratch
    """
    # Zero the halo scratches every step (cheap VPU stores). Doing it every
    # iteration keeps the halo exactly zero on every core, so the "parallel"
    # batch sharding on v7x stays correct.
    xpad_ref[...] = jnp.zeros_like(xpad_ref)
    ypad_ref[...] = jnp.zeros_like(ypad_ref)

    # Stage 1: Conv3x3 + BN (scale folded into weights) + ReLU.
    xpad_ref[1:H + 1, 1:W + 1, :] = x_ref[0, :, :, :].astype(jnp.float32)
    y1 = _conv3x3_folded_bn(xpad_ref[...], w1_ref, b1_ref[...],
                            H=H, W=W, Cout=Cmid, apply_relu=True)

    # Dropout2d: identity in eval mode.

    # Stage 2: the intermediate stays in VMEM, placed inside its halo so conv2
    # reads it directly — no HBM round trip.
    ypad_ref[1:H + 1, 1:W + 1, :] = y1
    y2 = _conv3x3_folded_bn(ypad_ref[...], w2_ref, b2_ref[...],
                            H=H, W=W, Cout=Cout, apply_relu=False)

    o_ref[...] = y2.reshape(1, H, W, Cout).astype(o_ref.dtype)


def _prep_conv_bn(w_oihw, gamma, beta, mean, var, eps=1e-5):
    """Fold BN scale into HWIO weights; return (3, 3*Cin, Cout) weights and (1, Cout) bias."""
    scale = gamma / jnp.sqrt(var + eps)               # (Cout,)
    bias = beta - mean * scale                        # (Cout,)
    w = jnp.transpose(w_oihw, (2, 3, 1, 0)) * scale   # OIHW -> HWIO, scale folded
    kh, kw, ci, co = w.shape
    return w.reshape(kh, kw * ci, co), bias.reshape(1, co)


def double_cbr(x_nchw, params):
    """DoubleCBR forward. x_nchw: (N, ic, H, W) -> (N, oc, H, W)."""
    x = jnp.transpose(x_nchw, (0, 2, 3, 1))           # NCHW -> NHWC
    N, H, W, Cin = x.shape

    w1, b1 = _prep_conv_bn(params["w1"], params["g1"], params["be1"],
                           params["m1"], params["v1"])
    w2, b2 = _prep_conv_bn(params["w2"], params["g2"], params["be2"],
                           params["m2"], params["v2"])
    Cmid = w1.shape[-1]
    Cout = w2.shape[-1]

    kern = functools.partial(_double_cbr_kernel,
                             H=H, W=W, Cin=Cin, Cmid=Cmid, Cout=Cout)

    y = pl.pallas_call(
        kern,
        out_shape=jax.ShapeDtypeStruct((N, H, W, Cout), x.dtype),
        grid_spec=pltpu.PrefetchScalarGridSpec(
            num_scalar_prefetch=0,
            grid=(N,),
            in_specs=[
                pl.BlockSpec((1, H, W, Cin), lambda n: (n, 0, 0, 0)),
                pl.BlockSpec((3, 3 * Cin, Cmid), lambda n: (0, 0, 0)),
                pl.BlockSpec((1, Cmid), lambda n: (0, 0)),
                pl.BlockSpec((3, 3 * Cmid, Cout), lambda n: (0, 0, 0)),
                pl.BlockSpec((1, Cout), lambda n: (0, 0)),
            ],
            out_specs=pl.BlockSpec((1, H, W, Cout), lambda n: (n, 0, 0, 0)),
            scratch_shapes=[
                pltpu.VMEM((H + 2, W + 2, Cin), jnp.float32),
                pltpu.VMEM((H + 2, W + 2, Cmid), jnp.float32),
            ],
        ),
        compiler_params=pltpu.CompilerParams(
            dimension_semantics=("parallel",)),      # batch is independent -> 2 TCs on v7x
    )(x, w1, b1, w2, b2)

    return jnp.transpose(y, (0, 3, 1, 2))             # NHWC -> NCHW


def double_cbr_reference(x_nchw, params):
    """Pure-JAX reference (lax.conv) for correctness checking."""
    def conv(x, w):
        return jax.lax.conv_general_dilated(
            x, w, window_strides=(1, 1), padding="SAME",
            dimension_numbers=("NCHW", "OIHW", "NCHW"))

    def bn(x, g, b, m, v, eps=1e-5):
        g, b, m, v = (t.reshape(1, -1, 1, 1) for t in (g, b, m, v))
        return (x - m) / jnp.sqrt(v + eps) * g + b

    y = conv(x_nchw, params["w1"])
    y = bn(y, params["g1"], params["be1"], params["m1"], params["v1"])
    y = jnp.maximum(y, 0.0)
    y = conv(y, params["w2"])
    y = bn(y, params["g2"], params["be2"], params["m2"], params["v2"])
    return y


if __name__ == "__main__":
    ic, mc, oc = 4, 8, 4
    N, H, W = 2, 16, 16

    key = jax.random.PRNGKey(0)
    keys = jax.random.split(key, 11)

    x = jax.random.normal(keys[0], (N, ic, H, W), dtype=jnp.float32)

    params = {
        "w1": jax.random.normal(keys[1], (mc, ic, 3, 3), dtype=jnp.float32) * 0.1,
        "g1": jax.random.uniform(keys[2], (mc,), minval=0.5, maxval=1.5,
                                 dtype=jnp.float32),
        "be1": jax.random.normal(keys[3], (mc,), dtype=jnp.float32) * 0.1,
        "m1": jax.random.normal(keys[4], (mc,), dtype=jnp.float32) * 0.1,
        "v1": jax.random.uniform(keys[5], (mc,), minval=0.5, maxval=1.5,
                                 dtype=jnp.float32),
        "w2": jax.random.normal(keys[6], (oc, mc, 3, 3), dtype=jnp.float32) * 0.1,
        "g2": jax.random.uniform(keys[7], (oc,), minval=0.5, maxval=1.5,
                                 dtype=jnp.float32),
        "be2": jax.random.normal(keys[8], (oc,), dtype=jnp.float32) * 0.1,
        "m2": jax.random.normal(keys[9], (oc,), dtype=jnp.float32) * 0.1,
        "v2": jax.random.uniform(keys[10], (oc,), minval=0.5, maxval=1.5,
                                 dtype=jnp.float32),
    }

    out = jax.jit(double_cbr)(x, params)
    out = jax.block_until_ready(out)

    ref = double_cbr_reference(x, params)
    assert out.shape == (N, oc, H, W), out.shape
    assert jnp.allclose(out, ref, atol=5e-4, rtol=5e-4), (
        float(jnp.max(jnp.abs(out - ref))))

    print("KERNEL_OK")
</pallas_src>

<mosaic_0001>
module attributes {stable_mosaic.version = 11 : i64} {
  func.func @_double_cbr_kernel(%arg0: i32, %arg1: memref<1x16x16x4xf32, #tpu.memory_space<vmem>>, %arg2: memref<3x12x8xf32, #tpu.memory_space<vmem>>, %arg3: memref<1x8xf32, #tpu.memory_space<vmem>>, %arg4: memref<3x24x4xf32, #tpu.memory_space<vmem>>, %arg5: memref<1x4xf32, #tpu.memory_space<vmem>>, %arg6: memref<1x16x16x4xf32, #tpu.memory_space<vmem>>, %arg7: memref<18x18x4xf32, #tpu.memory_space<vmem>>, %arg8: memref<18x18x8xf32, #tpu.memory_space<vmem>>) attributes {dimension_semantics = [#tpu.dimension_semantics<parallel>], iteration_bounds = array<i64: 2>, scalar_prefetch = 0 : i64, scratch_operands = 2 : i64, tpu.core_type = #tpu.core_type<tc>, window_params = [{transform_indices = @transform_0, window_bounds = array<i64: 1, 16, 16, 4>}, {pipeline_mode = #tpu.pipeline_mode<synchronous>, transform_indices = @transform_1, window_bounds = array<i64: 3, 12, 8>}, {pipeline_mode = #tpu.pipeline_mode<synchronous>, transform_indices = @transform_2, window_bounds = array<i64: 1, 8>}, {pipeline_mode = #tpu.pipeline_mode<synchronous>, transform_indices = @transform_3, window_bounds = array<i64: 3, 24, 4>}, {pipeline_mode = #tpu.pipeline_mode<synchronous>, transform_indices = @transform_4, window_bounds = array<i64: 1, 4>}, {transform_indices = @transform_5, window_bounds = array<i64: 1, 16, 16, 4>}]} {
    %cst = arith.constant 0.000000e+00 : f32
    %0 = vector.broadcast %cst : f32 to vector<18x18x4xf32>
    %c0 = arith.constant 0 : index
    %c0_0 = arith.constant 0 : index
    %c0_1 = arith.constant 0 : index
    %1 = vector.load %arg7[%c0, %c0_0, %c0_1] : memref<18x18x4xf32, #tpu.memory_space<vmem>>, vector<18x18x4xf32>
    tpu.vector_store %arg7[%c0, %c0_0, %c0_1], %0 {strides = array<i32>} : memref<18x18x4xf32, #tpu.memory_space<vmem>>, vector<18x18x4xf32>,
    %cst_2 = arith.constant 0.000000e+00 : f32
    %2 = vector.broadcast %cst_2 : f32 to vector<18x18x8xf32>
    %c0_3 = arith.constant 0 : index
    %c0_4 = arith.constant 0 : index
    %c0_5 = arith.constant 0 : index
    %3 = vector.load %arg8[%c0_3, %c0_4, %c0_5] : memref<18x18x8xf32, #tpu.memory_space<vmem>>, vector<18x18x8xf32>
    tpu.vector_store %arg8[%c0_3, %c0_4, %c0_5], %2 {strides = array<i32>} : memref<18x18x8xf32, #tpu.memory_space<vmem>>, vector<18x18x8xf32>,
    %c0_6 = arith.constant 0 : index
    %c0_7 = arith.constant 0 : index
    %c0_8 = arith.constant 0 : index
    %c0_9 = arith.constant 0 : index
    %4 = vector.load %arg1[%c0_6, %c0_7, %c0_8, %c0_9] : memref<1x16x16x4xf32, #tpu.memory_space<vmem>>, vector<1x16x16x4xf32>
    %5 = vector.shape_cast %4 : vector<1x16x16x4xf32> to vector<16x16x4xf32>
    %c1 = arith.constant 1 : index
    %c1_10 = arith.constant 1 : index
    %c0_11 = arith.constant 0 : index
    %6 = vector.load %arg7[%c1, %c1_10, %c0_11] : memref<18x18x4xf32, #tpu.memory_space<vmem>>, vector<16x16x4xf32>
    tpu.vector_store %arg7[%c1, %c1_10, %c0_11], %5 {strides = array<i32>} : memref<18x18x4xf32, #tpu.memory_space<vmem>>, vector<16x16x4xf32>,
    %c0_12 = arith.constant 0 : index
    %c0_13 = arith.constant 0 : index
    %c0_14 = arith.constant 0 : index
    %7 = vector.load %arg7[%c0_12, %c0_13, %c0_14] : memref<18x18x4xf32, #tpu.memory_space<vmem>>, vector<18x18x4xf32>
    %c0_15 = arith.constant 0 : index
    %c0_16 = arith.constant 0 : index
    %8 = vector.load %arg3[%c0_15, %c0_16] : memref<1x8xf32, #tpu.memory_space<vmem>>, vector<1x8xf32>
    %9 = vector.extract_strided_slice %7 {offsets = [0, 0, 0], sizes = [18, 16, 4], strides = [1, 1, 1]} : vector<18x18x4xf32> to vector<18x16x4xf32>
    %10 = vector.extract_strided_slice %7 {offsets = [0, 1, 0], sizes = [18, 16, 4], strides = [1, 1, 1]} : vector<18x18x4xf32> to vector<18x16x4xf32>
    %11 = vector.extract_strided_slice %7 {offsets = [0, 2, 0], sizes = [18, 16, 4], strides = [1, 1, 1]} : vector<18x18x4xf32> to vector<18x16x4xf32>
    %12 = tpu.concatenate %9, %10, %11 in 2 : vector<18x16x4xf32>, vector<18x16x4xf32>, vector<18x16x4xf32> -> vector<18x16x12xf32>
    %cst_17 = arith.constant 0.000000e+00 : f32
    %13 = vector.broadcast %cst_17 : f32 to vector<256x8xf32>
    %14 = vector.extract_strided_slice %12 {offsets = [0, 0, 0], sizes = [16, 16, 12], strides = [1, 1, 1]} : vector<18x16x12xf32> to vector<16x16x12xf32>
    %15 = vector.shape_cast %14 : vector<16x16x12xf32> to vector<256x12xf32>
    %c0_18 = arith.constant 0 : index
    %c0_19 = arith.constant 0 : index
    %c0_20 = arith.constant 0 : index
    %16 = vector.load %arg2[%c0_18, %c0_19, %c0_20] : memref<3x12x8xf32, #tpu.memory_space<vmem>>, vector<1x12x8xf32>
    %17 = vector.shape_cast %16 : vector<1x12x8xf32> to vector<12x8xf32>
    %cst_21 = arith.constant dense<0.000000e+00> : vector<256x8xf32>
    %18 = tpu.matmul %15, %17, %cst_21 {dimension_numbers = #tpu.dot_dimension_numbers<[1], [0], [0], [1], [0, 0, 1, 1], [], []>} : vector<256x12xf32>, vector<12x8xf32>, vector<256x8xf32> -> vector<256x8xf32>
    %19 = arith.addf %13, %18 : vector<256x8xf32>
    %20 = vector.extract_strided_slice %12 {offsets = [1, 0, 0], sizes = [16, 16, 12], strides = [1, 1, 1]} : vector<18x16x12xf32> to vector<16x16x12xf32>
    %21 = vector.shape_cast %20 : vector<16x16x12xf32> to vector<256x12xf32>
    %c1_22 = arith.constant 1 : index
    %c0_23 = arith.constant 0 : index
    %c0_24 = arith.constant 0 : index
    %22 = vector.load %arg2[%c1_22, %c0_23, %c0_24] : memref<3x12x8xf32, #tpu.memory_space<vmem>>, vector<1x12x8xf32>
    %23 = vector.shape_cast %22 : vector<1x12x8xf32> to vector<12x8xf32>
    %cst_25 = arith.constant dense<0.000000e+00> : vector<256x8xf32>
    %24 = tpu.matmul %21, %23, %cst_25 {dimension_numbers = #tpu.dot_dimension_numbers<[1], [0], [0], [1], [0, 0, 1, 1], [], []>} : vector<256x12xf32>, vector<12x8xf32>, vector<256x8xf32> -> vector<256x8xf32>
    %25 = arith.addf %19, %24 : vector<256x8xf32>
    %26 = vector.extract_strided_slice %12 {offsets = [2, 0, 0], sizes = [16, 16, 12], strides = [1, 1, 1]} : vector<18x16x12xf32> to vector<16x16x12xf32>
    %27 = vector.shape_cast %26 : vector<16x16x12xf32> to vector<256x12xf32>
    %c2 = arith.constant 2 : index
    %c0_26 = arith.constant 0 : index
    %c0_27 = arith.constant 0 : index
    %28 = vector.load %arg2[%c2, %c0_26, %c0_27] : memref<3x12x8xf32, #tpu.memory_space<vmem>>, vector<1x12x8xf32>
    %29 = vector.shape_cast %28 : vector<1x12x8xf32> to vector<12x8xf32>
    %cst_28 = arith.constant dense<0.000000e+00> : vector<256x8xf32>
    %30 = tpu.matmul %27, %29, %cst_28 {dimension_numbers = #tpu.dot_dimension_numbers<[1], [0], [0], [1], [0, 0, 1, 1], [], []>} : vector<256x12xf32>, vector<12x8xf32>, vector<256x8xf32> -> vector<256x8xf32>
    %31 = arith.addf %25, %30 : vector<256x8xf32>
    %32 = vector.broadcast %8 : vector<1x8xf32> to vector<256x8xf32>
    %33 = arith.addf %31, %32 : vector<256x8xf32>
    %cst_29 = arith.constant 0.000000e+00 : f32
    %34 = vector.broadcast %cst_29 : f32 to vector<256x8xf32>
    %35 = arith.maximumf %33, %34 : vector<256x8xf32>
    %36 = vector.shape_cast %35 : vector<256x8xf32> to vector<16x16x8xf32>
    %c1_30 = arith.constant 1 : index
    %c1_31 = arith.constant 1 : index
    %c0_32 = arith.constant 0 : index
    %37 = vector.load %arg8[%c1_30, %c1_31, %c0_32] : memref<18x18x8xf32, #tpu.memory_space<vmem>>, vector<16x16x8xf32>
    tpu.vector_store %arg8[%c1_30, %c1_31, %c0_32], %36 {strides = array<i32>} : memref<18x18x8xf32, #tpu.memory_space<vmem>>, vector<16x16x8xf32>,
    %c0_33 = arith.constant 0 : index
    %c0_34 = arith.constant 0 : index
    %c0_35 = arith.constant 0 : index
    %38 = vector.load %arg8[%c0_33, %c0_34, %c0_35] : memref<18x18x8xf32, #tpu.memory_space<vmem>>, vector<18x18x8xf32>
    %c0_36 = arith.constant 0 : index
    %c0_37 = arith.constant 0 : index
    %39 = vector.load %arg5[%c0_36, %c0_37] : memref<1x4xf32, #tpu.memory_space<vmem>>, vector<1x4xf32>
    %40 = vector.extract_strided_slice %38 {offsets = [0, 0, 0], sizes = [18, 16, 8], strides = [1, 1, 1]} : vector<18x18x8xf32> to vector<18x16x8xf32>
    %41 = vector.extract_strided_slice %38 {offsets = [0, 1, 0], sizes = [18, 16, 8], strides = [1, 1, 1]} : vector<18x18x8xf32> to vector<18x16x8xf32>
    %42 = vector.extract_strided_slice %38 {offsets = [0, 2, 0], sizes = [18, 16, 8], strides = [1, 1, 1]} : vector<18x18x8xf32> to vector<18x16x8xf32>
    %43 = tpu.concatenate %40, %41, %42 in 2 : vector<18x16x8xf32>, vector<18x16x8xf32>, vector<18x16x8xf32> -> vector<18x16x24xf32>
    %cst_38 = arith.constant 0.000000e+00 : f32
    %44 = vector.broadcast %cst_38 : f32 to vector<256x4xf32>
    %45 = vector.extract_strided_slice %43 {offsets = [0, 0, 0], sizes = [16, 16, 24], strides = [1, 1, 1]} : vector<18x16x24xf32> to vector<16x16x24xf32>
    %46 = vector.shape_cast %45 : vector<16x16x24xf32> to vector<256x24xf32>
    %c0_39 = arith.constant 0 : index
    %c0_40 = arith.constant 0 : index
    %c0_41 = arith.constant 0 : index
    %47 = vector.load %arg4[%c0_39, %c0_40, %c0_41] : memref<3x24x4xf32, #tpu.memory_space<vmem>>, vector<1x24x4xf32>
    %48 = vector.shape_cast %47 : vector<1x24x4xf32> to vector<24x4xf32>
    %cst_42 = arith.constant dense<0.000000e+00> : vector<256x4xf32>
    %49 = tpu.matmul %46, %48, %cst_42 {dimension_numbers = #tpu.dot_dimension_numbers<[1], [0], [0], [1], [0, 0, 1, 1], [], []>} : vector<256x24xf32>, vector<24x4xf32>, vector<256x4xf32> -> vector<256x4xf32>
    %50 = arith.addf %44, %49 : vector<256x4xf32>
    %51 = vector.extract_strided_slice %43 {offsets = [1, 0, 0], sizes = [16, 16, 24], strides = [1, 1, 1]} : vector<18x16x24xf32> to vector<16x16x24xf32>
    %52 = vector.shape_cast %51 : vector<16x16x24xf32> to vector<256x24xf32>
    %c1_43 = arith.constant 1 : index
    %c0_44 = arith.constant 0 : index
    %c0_45 = arith.constant 0 : index
    %53 = vector.load %arg4[%c1_43, %c0_44, %c0_45] : memref<3x24x4xf32, #tpu.memory_space<vmem>>, vector<1x24x4xf32>
    %54 = vector.shape_cast %53 : vector<1x24x4xf32> to vector<24x4xf32>
    %cst_46 = arith.constant dense<0.000000e+00> : vector<256x4xf32>
    %55 = tpu.matmul %52, %54, %cst_46 {dimension_numbers = #tpu.dot_dimension_numbers<[1], [0], [0], [1], [0, 0, 1, 1], [], []>} : vector<256x24xf32>, vector<24x4xf32>, vector<256x4xf32> -> vector<256x4xf32>
    %56 = arith.addf %50, %55 : vector<256x4xf32>
    %57 = vector.extract_strided_slice %43 {offsets = [2, 0, 0], sizes = [16, 16, 24], strides = [1, 1, 1]} : vector<18x16x24xf32> to vector<16x16x24xf32>
    %58 = vector.shape_cast %57 : vector<16x16x24xf32> to vector<256x24xf32>
    %c2_47 = arith.constant 2 : index
    %c0_48 = arith.constant 0 : index
    %c0_49 = arith.constant 0 : index
    %59 = vector.load %arg4[%c2_47, %c0_48, %c0_49] : memref<3x24x4xf32, #tpu.memory_space<vmem>>, vector<1x24x4xf32>
    %60 = vector.shape_cast %59 : vector<1x24x4xf32> to vector<24x4xf32>
    %cst_50 = arith.constant dense<0.000000e+00> : vector<256x4xf32>
    %61 = tpu.matmul %58, %60, %cst_50 {dimension_numbers = #tpu.dot_dimension_numbers<[1], [0], [0], [1], [0, 0, 1, 1], [], []>} : vector<256x24xf32>, vector<24x4xf32>, vector<256x4xf32> -> vector<256x4xf32>
    %62 = arith.addf %56, %61 : vector<256x4xf32>
    %63 = vector.broadcast %39 : vector<1x4xf32> to vector<256x4xf32>
    %64 = arith.addf %62, %63 : vector<256x4xf32>
    %65 = vector.shape_cast %64 : vector<256x4xf32> to vector<16x16x4xf32>
    %66 = vector.shape_cast %65 : vector<16x16x4xf32> to vector<1x16x16x4xf32>
    %c0_51 = arith.constant 0 : index
    %c0_52 = arith.constant 0 : index
    %c0_53 = arith.constant 0 : index
    %c0_54 = arith.constant 0 : index
    %67 = vector.load %arg6[%c0_51, %c0_52, %c0_53, %c0_54] : memref<1x16x16x4xf32, #tpu.memory_space<vmem>>, vector<1x16x16x4xf32>
    tpu.vector_store %arg6[%c0_51, %c0_52, %c0_53, %c0_54], %66 {strides = array<i32>} : memref<1x16x16x4xf32, #tpu.memory_space<vmem>>, vector<1x16x16x4xf32>,
    return
  }
  func.func @transform_0(%arg0: i32) -> (i32, i32, i32, i32) {
    %c0_i32 = arith.constant 0 : i32
    %c0_i32_0 = arith.constant 0 : i32
    %c0_i32_1 = arith.constant 0 : i32
    %c0_i32_2 = arith.constant 0 : i32
    return %arg0, %c0_i32, %c0_i32_0, %c0_i32_1 : i32, i32, i32, i32
  }
  func.func @transform_1(%arg0: i32) -> (i32, i32, i32) {
    %c0_i32 = arith.constant 0 : i32
    %c0_i32_0 = arith.constant 0 : i32
    %c0_i32_1 = arith.constant 0 : i32
    %c0_i32_2 = arith.constant 0 : i32
    return %c0_i32, %c0_i32_0, %c0_i32_1 : i32, i32, i32
  }
  func.func @transform_2(%arg0: i32) -> (i32, i32) {
    %c0_i32 = arith.constant 0 : i32
    %c0_i32_0 = arith.constant 0 : i32
    %c0_i32_1 = arith.constant 0 : i32
    return %c0_i32, %c0_i32_0 : i32, i32
  }
  func.func @transform_3(%arg0: i32) -> (i32, i32, i32) {
    %c0_i32 = arith.constant 0 : i32
    %c0_i32_0 = arith.constant 0 : i32
    %c0_i32_1 = arith.constant 0 : i32
    %c0_i32_2 = arith.constant 0 : i32
    return %c0_i32, %c0_i32_0, %c0_i32_1 : i32, i32, i32
  }
  func.func @transform_4(%arg0: i32) -> (i32, i32) {
    %c0_i32 = arith.constant 0 : i32
    %c0_i32_0 = arith.constant 0 : i32
    %c0_i32_1 = arith.constant 0 : i32
    return %c0_i32, %c0_i32_0 : i32, i32
  }
  func.func @transform_5(%arg0: i32) -> (i32, i32, i32, i32) {
    %c0_i32 = arith.constant 0 : i32
    %c0_i32_0 = arith.constant 0 : i32
    %c0_i32_1 = arith.constant 0 : i32
    %c0_i32_2 = arith.constant 0 : i32
    return %arg0, %c0_i32, %c0_i32_0, %c0_i32_1 : i32, i32, i32, i32
  }
}

</mosaic_0001>

<bundles_post_ra>
// kernel: double_cbr.1
= control target key start
LH: loop header
LB: loop body
LE: loop exit
PB: predicated region body
PF: predicated region fallthrough
CT: control target
= control target key end

     0   :  { %s4409_s18 = smov 0   ;;  %s6279_s0 = inlined_call_operand.vmem [shape: f32[2,16,16,4], index: 0, kind: input, shape index: {}]   ;;  %s6280_s1 = inlined_call_operand.vmem [shape: f32[3,12,8], index: 1, kind: input, shape index: {}]   ;;  %s6281_s2 = inlined_call_operand.vmem [shape: f32[1,8], index: 2, kind: input, shape index: {}]   ;;  %s6282_s3 = inlined_call_operand.vmem [shape: f32[3,24,4], index: 3, kind: input, shape index: {}]   ;;  %s6283_s4 = inlined_call_operand.vmem [shape: f32[1,4], index: 4, kind: input, shape index: {}]   ;;  %s6284_s5 = inlined_call_operand.vmem [shape: f32[2,16,16,4], index: 5, kind: output, shape index: {}]  }
   0x1 LB: > { %s3448_s19 = sadd.s32 4294967295, %s4372_s18   ;;  %p3452_p0 = scmp.ge.s32.totalorder %s4372_s18, 1  ;;  %s4372_s18 = sphi %s4409_s18, %s15_s18  }
   0x2   : > { %p187_p1 = scmp.lt.s32.totalorder %s4372_s18, 3 }
   0x4   : > { %p188_p2 = pnand %p3452_p0, %p187_p1 }
   0x5   : > { %p4419_p3 = scmp.lt.s32.totalorder (!%p188_p2), %s3448_s19, 1  ;;  %vm225_vm0 = vcmask (!%p188_p2), 31744   ;;  %vm228_vm1 = vcmask (!%p188_p2), 25600   ;;  %v4374_v0 = vmov (!%p188_p2), 0.0   ;;  %vm281_vm2 = vcmask (!%p188_p2), 64512   ;;  %v3457_v7 = vld [vmem:[%s6280_s1 + $0x10] sm:$0xff] (!%p188_p2) }
   0x6   : > { %191 = sbr.rel (%p188_p2) target bundleno = 1189 (0x4a5), region = 40  ;;  %230 = vst.msk [vmem:[#allocation2 + $0x18] sm:$0xff] (!%p188_p2), %vm225_vm0, %v4374_v0  ;;  %231 = vst.msk [vmem:[#allocation2 + $0x20] sm:$0xff] (!%p188_p2), %vm225_vm0, %v4374_v0  ;;  %v3458_v8 = vld [vmem:[%s6280_s1 + $0x18] sm:$0xf] (!%p188_p2)  ;;  %vm1083_vm3 = vcmask (!%p188_p2), 1043456  }
   0x7   : > { %232 = vst.msk [vmem:[#allocation2 + $0x28] sm:$0x3] (!%p188_p2), %vm228_vm1, %v4374_v0  ;;  %229 = vst.msk [vmem:[#allocation2 + $0x10] sm:$0x3] (!%p188_p2), %vm228_vm1, %v4374_v0  ;;  %v4193_v24 = vpack.c.bf16 (!%p188_p2), %v3458_v8, %v3457_v7  ;;  %vm710_vm4 = vcmask (!%p188_p2), 1045504   ;;  %vm511_vm5 = vcmask (!%p188_p2), 1046528  }
   0x8   : > { %226 = vst.msk [vmem:[#allocation2] sm:$0xff] (!%p188_p2), %vm225_vm0, %v4374_v0  ;;  %227 = vst.msk [vmem:[#allocation2 + $0x8] sm:$0xff] (!%p188_p2), %vm225_vm0, %v4374_v0  ;;  %vm4375_vm6 = vmmov (!%p188_p2), 1   ;;  %s4376_s29 = smov (!%p188_p2), 8   ;;  %s4377_s30 = smov (!%p188_p2), 4   ;;  %vm986_vm8 = vcmask (!%p188_p2), 97280  }
   0x9   : > { %233 = vst.msk [vmem:[#allocation2 + $0x30] sm:$0xff] (!%p188_p2), %vm225_vm0, %v4374_v0  ;;  %234 = vst.msk [vmem:[#allocation2 + $0x38] sm:$0xff] (!%p188_p2), %vm225_vm0, %v4374_v0  ;;  %vm284_vm9 = vcmask (!%p188_p2), 58368   ;;  %s4378_s25 = smov (!%p188_p2), 16   ;;  %vm2459_vm10 = vcmask (!%p188_p2), 130048   ;;  %vm2503_vm11 = vcmask (!%p188_p2), 195584  }
   0xa   : > { %235 = vst.msk [vmem:[#allocation2 + $0x40] sm:$0x3] (!%p188_p2), %vm228_vm1, %v4374_v0  ;;  %238 = vst.msk [vmem:[#allocation2 + $0x58] sm:$0x3] (!%p188_p2), %vm228_vm1, %v4374_v0 }
   0xb   : > { %236 = vst.msk [vmem:[#allocation2 + $0x48] sm:$0xff] (!%p188_p2), %vm225_vm0, %v4374_v0  ;;  %237 = vst.msk [vmem:[#allocation2 + $0x50] sm:$0xff] (!%p188_p2), %vm225_vm0, %v4374_v0 }
   0xc   : > { %239 = vst.msk [vmem:[#allocation2 + $0x60] sm:$0xff] (!%p188_p2), %vm225_vm0, %v4374_v0  ;;  %240 = vst.msk [vmem:[#allocation2 + $0x68] sm:$0xff] (!%p188_p2), %vm225_vm0, %v4374_v0 }
   0xd   : > { %241 = vst.msk [vmem:[#allocation2 + $0x70] sm:$0x3] %vm228_vm1, %v4374_v0  ;;  %244 = vst.msk [vmem:[#allocation2 + $0x88] sm:$0x3] %vm228_vm1, %v4374_v0  ;;  %s6289_s19 = smov (!%p4419_p3, %s3448_s19), 1 }
   0xe   : > { %242 = vst.msk [vmem:[#allocation2 + $0x78] sm:$0xff] %vm225_vm0, %v4374_v0  ;;  %243 = vst.msk [vmem:[#allocation2 + $0x80] sm:$0xff] %vm225_vm0, %v4374_v0  ;;  %s3666_s21 = sshll.u32 %s6289_s19, 8 }
   0xf   : > { %245 = vst.msk [vmem:[#allocation2 + $0x90] sm:$0xff] %vm225_vm0, %v4374_v0  ;;  %246 = vst.msk [vmem:[#allocation2 + $0x98] sm:$0xff] %vm225_vm0, %v4374_v0  ;;  %s4543_s24 = scalar_lea.vmem %s6279_s0, %s3666_s21  ;;  %s6178_s17 = scalar_lea.vmem %s6284_s5, %s3666_s21 }
  0x10   : > { %247 = vst.msk [vmem:[#allocation2 + $0xa0] sm:$0x3] %vm228_vm1, %v4374_v0  ;;  %250 = vst.msk [vmem:[#allocation2 + $0xb8] sm:$0x3] %vm228_vm1, %v4374_v0  ;;  %v337_v1 = vld [vmem:[%s4543_s24] sm:$0xff]  ;;  %v338_v2 = vld [vmem:[%s4543_s24 + $0x8] sm:$0xff] }
  0x11   : > { %248 = vst.msk [vmem:[#allocation2 + $0xa8] sm:$0xff] %vm225_vm0, %v4374_v0  ;;  %249 = vst.msk [vmem:[#allocation2 + $0xb0] sm:$0xff] %vm225_vm0, %v4374_v0  ;;  %v339_v3 = vld [vmem:[%s4543_s24 + $0x10] sm:$0xff]  ;;  %v340_v4 = vld [vmem:[%s4543_s24 + $0x18] sm:$0xff] }
  0x12   : > { %251 = vst.msk [vmem:[#allocation2 + $0xc0] sm:$0xff] %vm225_vm0, %v4374_v0  ;;  %252 = vst.msk [vmem:[#allocation2 + $0xc8] sm:$0xff] %vm225_vm0, %v4374_v0  ;;  %v341_v5 = vld [vmem:[%s4543_s24 + $0x20] sm:$0xff]  ;;  %v342_v6 = vld [vmem:[%s4543_s24 + $0x28] sm:$0xff] }
  0x13   : > { %253 = vst.msk [vmem:[#allocation2 + $0xd0] sm:$0x3] %vm228_vm1, %v4374_v0  ;;  %256 = vst.msk [vmem:[#allocation2 + $0xe8] sm:$0x3] %vm228_vm1, %v4374_v0  ;;  %v343_v9 = vld [vmem:[%s4543_s24 + $0x30] sm:$0xff]  ;;  %v344_v10 = vld [vmem:[%s4543_s24 + $0x38] sm:$0xff] }
  0x14   : > { %254 = vst.msk [vmem:[#allocation2 + $0xd8] sm:$0xff] %vm225_vm0, %v4374_v0  ;;  %255 = vst.msk [vmem:[#allocation2 + $0xe0] sm:$0xff] %vm225_vm0, %v4374_v0  ;;  %v345_v11 = vld [vmem:[%s4543_s24 + $0x40] sm:$0xff]  ;;  %v346_v12 = vld [vmem:[%s4543_s24 + $0x48] sm:$0xff] }
  0x15   : > { %257 = vst.msk [vmem:[#allocation2 + $0xf0] sm:$0xff] %vm225_vm0, %v4374_v0  ;;  %258 = vst.msk [vmem:[#allocation2 + $0xf8] sm:$0xff] %vm225_vm0, %v4374_v0  ;;  %v347_v13 = vld [vmem:[%s4543_s24 + $0x50] sm:$0xff]  ;;  %v348_v14 = vld [vmem:[%s4543_s24 + $0x58] sm:$0xff] }
  0x16   : > { %259 = vst.msk [vmem:[#allocation2 + $0x100] sm:$0x3] %vm228_vm1, %v4374_v0  ;;  %262 = vst.msk [vmem:[#allocation2 + $0x118] sm:$0x3] %vm228_vm1, %v4374_v0  ;;  %v349_v15 = vld [vmem:[%s4543_s24 + $0x60] sm:$0xff]  ;;  %v350_v16 = vld [vmem:[%s4543_s24 + $0x68] sm:$0xff] }
  0x17   : > { %260 = vst.msk [vmem:[#allocation2 + $0x108] sm:$0xff] %vm225_vm0, %v4374_v0  ;;  %261 = vst.msk [vmem:[#allocation2 + $0x110] sm:$0xff] %vm225_vm0, %v4374_v0  ;;  %v351_v17 = vld [vmem:[%s4543_s24 + $0x70] sm:$0xff]  ;;  %v352_v18 = vld [vmem:[%s4543_s24 + $0x78] sm:$0xff] }
  0x18   : > { %263 = vst.msk [vmem:[#allocation2 + $0x120] sm:$0xff] %vm225_vm0, %v4374_v0  ;;  %264 = vst.msk [vmem:[#allocation2 + $0x128] sm:$0xff] %vm225_vm0, %v4374_v0  ;;  %v353_v19 = vld [vmem:[%s4543_s24 + $0x80] sm:$0xff]  ;;  %v354_v20 = vld [vmem:[%s4543_s24 + $0x88] sm:$0xff] }
  0x19   : > { %265 = vst.msk [vmem:[#allocation2 + $0x130] sm:$0x3] %vm228_vm1, %v4374_v0  ;;  %268 = vst.msk [vmem:[#allocation2 + $0x148] sm:$0x3] %vm228_vm1, %v4374_v0  ;;  %v355_v21 = vld [vmem:[%s4543_s24 + $0x90] sm:$0xff]  ;;  %v356_v22 = vld [vmem:[%s4543_s24 + $0x98] sm:$0xff] }
  0x1a   : > { %266 = vst.msk [vmem:[#allocation2 + $0x138] sm:$0xff] %vm225_vm0, %v4374_v0  ;;  %267 = vst.msk [vmem:[#allocation2 + $0x140] sm:$0xff] %vm225_vm0, %v4374_v0  ;;  %v357_v23 = vld [vmem:[%s4543_s24 + $0xa0] sm:$0xff]  ;;  %v358_v25 = vld [vmem:[%s4543_s24 + $0xa8] sm:$0xff] }
  0x1b   : > { %269 = vst.msk [vmem:[#allocation2 + $0x150] sm:$0xff] %vm225_vm0, %v4374_v0  ;;  %270 = vst.msk [vmem:[#allocation2 + $0x158] sm:$0xff] %vm225_vm0, %v4374_v0  ;;  %v359_v26 = vld [vmem:[%s4543_s24 + $0xb0] sm:$0xff]  ;;  %v360_v27 = vld [vmem:[%s4543_s24 + $0xb8] sm:$0xff] }
  0x1c   : > { %271 = vst.msk [vmem:[#allocation2 + $0x160] sm:$0x3] %vm228_vm1, %v4374_v0  ;;  %274 = vst.msk [vmem:[#allocation2 + $0x178] sm:$0x3] %vm228_vm1, %v4374_v0  ;;  %v361_v61 = vld [vmem:[%s4543_s24 + $0xc0] sm:$0xff]  ;;  %v362_v62 = vld [vmem:[%s4543_s24 + $0xc8] sm:$0xff] }
  0x1d   : > { %272 = vst.msk [vmem:[#allocation2 + $0x168] sm:$0xff] %vm225_vm0, %v4374_v0  ;;  %273 = vst.msk [vmem:[#allocation2 + $0x170] sm:$0xff] %vm225_vm0, %v4374_v0  ;;  %v363_v63 = vld [vmem:[%s4543_s24 + $0xd0] sm:$0xff] }
  0x1e   : > { %275 = vst.msk [vmem:[#allocation2 + $0x180] sm:$0xff] %vm225_vm0, %v4374_v0  ;;  %276 = vst.msk [vmem:[#allocation2 + $0x188] sm:$0xff] %vm225_vm0, %v4374_v0 }
  0x1f   : > { %277 = vst.msk [vmem:[#allocation2 + $0x190] sm:$0x3] %vm228_vm1, %v4374_v0  ;;  %280 = vst.msk [vmem:[#allocation2 + $0x1a8] sm:$0x3] %vm228_vm1, %v4374_v0 }
  0x20   : > { %278 = vst.msk [vmem:[#allocation2 + $0x198] sm:$0xff] %vm225_vm0, %v4374_v0  ;;  %279 = vst.msk [vmem:[#allocation2 + $0x1a0] sm:$0xff] %vm225_vm0, %v4374_v0 }
  0x21   : > { %282 = vst.msk [vmem:[#allocation3] sm:$0xff] %vm281_vm2, %v4374_v0  ;;  %283 = vst.msk [vmem:[#allocation3 + $0x8] sm:$0xff] %vm281_vm2, %v4374_v0 }
  0x22   : > { %286 = vst.msk [vmem:[#allocation3 + $0x18] sm:$0xff] %vm281_vm2, %v4374_v0  ;;  %287 = vst.msk [vmem:[#allocation3 + $0x20] sm:$0xff] %vm281_vm2, %v4374_v0 }
  0x23   : > { %289 = vst.msk [vmem:[#allocation3 + $0x30] sm:$0xff] %vm281_vm2, %v4374_v0  ;;  %290 = vst.msk [vmem:[#allocation3 + $0x38] sm:$0xff] %vm281_vm2, %v4374_v0 }
  0x24   : > { %292 = vst.msk [vmem:[#allocation3 + $0x48] sm:$0xff] %vm281_vm2, %v4374_v0  ;;  %293 = vst.msk [vmem:[#allocation3 + $0x50] sm:$0xff] %vm281_vm2, %v4374_v0 }
  0x25   : > { %295 = vst.msk [vmem:[#allocation3 + $0x60] sm:$0xff] %vm281_vm2, %v4374_v0  ;;  %296 = vst.msk [vmem:[#allocation3 + $0x68] sm:$0xff] %vm281_vm2, %v4374_v0 }
  0x26   : > { %298 = vst.msk [vmem:[#allocation3 + $0x78] sm:$0xff] %vm281_vm2, %v4374_v0  ;;  %299 = vst.msk [vmem:[#allocation3 + $0x80] sm:$0xff] %vm281_vm2, %v4374_v0 }
  0x27   : > { %301 = vst.msk [vmem:[#allocation3 + $0x90] sm:$0xff] %vm281_vm2, %v4374_v0  ;;  %302 = vst.msk [vmem:[#allocation3 + $0x98] sm:$0xff] %vm281_vm2, %v4374_v0 }
  0x28   : > { %304 = vst.msk [vmem:[#allocation3 + $0xa8] sm:$0xff] %vm281_vm2, %v4374_v0  ;;  %305 = vst.msk [vmem:[#allocation3 + $0xb0] sm:$0xff] %vm281_vm2, %v4374_v0 }
  0x29   : > { %307 = vst.msk [vmem:[#allocation3 + $0xc0] sm:$0xff] %vm281_vm2, %v4374_v0  ;;  %308 = vst.msk [vmem:[#allocation3 + $0xc8] sm:$0xff] %vm281_vm2, %v4374_v0 }
  0x2a   : > { %310 = vst.msk [vmem:[#allocation3 + $0xd8] sm:$0xff] %vm281_vm2, %v4374_v0  ;;  %311 = vst.msk [vmem:[#allocation3 + $0xe0] sm:$0xff] %vm281_vm2, %v4374_v0 }
  0x2b   : > { %313 = vst.msk [vmem:[#allocation3 + $0xf0] sm:$0xff] %vm281_vm2, %v4374_v0  ;;  %314 = vst.msk [vmem:[#allocation3 + $0xf8] sm:$0xff] %vm281_vm2, %v4374_v0 }
  0x2c   : > { %316 = vst.msk [vmem:[#allocation3 + $0x108] sm:$0xff] %vm281_vm2, %v4374_v0  ;;  %317 = vst.msk [vmem:[#allocation3 + $0x110] sm:$0xff] %vm281_vm2, %v4374_v0 }
  0x2d   : > { %319 = vst.msk [vmem:[#allocation3 + $0x120] sm:$0xff] %vm281_vm2, %v4374_v0  ;;  %320 = vst.msk [vmem:[#allocation3 + $0x128] sm:$0xff] %vm281_vm2, %v4374_v0 }
  0x2e   : > { %322 = vst.msk [vmem:[#allocation3 + $0x138] sm:$0xff] %vm281_vm2, %v4374_v0  ;;  %323 = vst.msk [vmem:[#allocation3 + $0x140] sm:$0xff] %vm281_vm2, %v4374_v0 }
  0x2f   : > { %325 = vst.msk [vmem:[#allocation3 + $0x150] sm:$0xff] %vm281_vm2, %v4374_v0  ;;  %326 = vst.msk [vmem:[#allocation3 + $0x158] sm:$0xff] %vm281_vm2, %v4374_v0 }
  0x30   : > { %328 = vst.msk [vmem:[#allocation3 + $0x168] sm:$0xff] %vm281_vm2, %v4374_v0  ;;  %329 = vst.msk [vmem:[#allocation3 + $0x170] sm:$0xff] %vm281_vm2, %v4374_v0 }
  0x31   : > { %331 = vst.msk [vmem:[#allocation3 + $0x180] sm:$0xff] %vm281_vm2, %v4374_v0  ;;  %332 = vst.msk [vmem:[#allocation3 + $0x188] sm:$0xff] %vm281_vm2, %v4374_v0 }
  0x32   : > { %334 = vst.msk [vmem:[#allocation3 + $0x198] sm:$0xff] %vm281_vm2, %v4374_v0  ;;  %335 = vst.msk [vmem:[#allocation3 + $0x1a0] sm:$0xff] %vm281_vm2, %v4374_v0 }
  0x33   : > { %370 = vst.msk [vmem:[#allocation2 + $0x19] sm:$0xff] %vm225_vm0, %v337_v1  ;;  %371 = vst.msk [vmem:[#allocation2 + $0x21] sm:$0xff] %vm225_vm0, %v338_v2  ;;  %v364_v1 = vld [vmem:[%s4543_s24 + $0xd8] sm:$0xff]  ;;  %v365_v2 = vld [vmem:[%s4543_s24 + $0xe0] sm:$0xff] }
  0x34   : > { %372 = vst.msk [vmem:[#allocation2 + $0x31] sm:$0xff] %vm225_vm0, %v339_v3  ;;  %373 = vst.msk [vmem:[#allocation2 + $0x39] sm:$0xff] %vm225_vm0, %v340_v4  ;;  %v366_v4 = vld [vmem:[%s4543_s24 + $0xe8] sm:$0xff] }
  0x35   : > { %374 = vst.msk [vmem:[#allocation2 + $0x49] sm:$0xff] %vm225_vm0, %v341_v5  ;;  %375 = vst.msk [vmem:[#allocation2 + $0x51] sm:$0xff] %vm225_vm0, %v342_v6  ;;  %v367_v5 = vld [vmem:[%s4543_s24 + $0xf0] sm:$0xff] }
  0x36   : > { %376 = vst.msk [vmem:[#allocation2 + $0x61] sm:$0xff] %vm225_vm0, %v343_v9  ;;  %377 = vst.msk [vmem:[#allocation2 + $0x69] sm:$0xff] %vm225_vm0, %v344_v10 }
  0x37   : > { %378 = vst.msk [vmem:[#allocation2 + $0x79] sm:$0xff] %vm225_vm0, %v345_v11  ;;  %379 = vst.msk [vmem:[#allocation2 + $0x81] sm:$0xff] %vm225_vm0, %v346_v12  ;;  %v368_v11 = vld [vmem:[%s4543_s24 + $0xf8] sm:$0xff] }
  0x38   : > { %380 = vst.msk [vmem:[#allocation2 + $0x91] sm:$0xff] %vm225_vm0, %v347_v13  ;;  %381 = vst.msk [vmem:[#allocation2 + $0x99] sm:$0xff] %vm225_vm0, %v348_v14 }
  0x39   : > { %382 = vst.msk [vmem:[#allocation2 + $0xa9] sm:$0xff] %vm225_vm0, %v349_v15  ;;  %383 = vst.msk [vmem:[#allocation2 + $0xb1] sm:$0xff] %vm225_vm0, %v350_v16 }
  0x3a   : > { %384 = vst.msk [vmem:[#allocation2 + $0xc1] sm:$0xff] %vm225_vm0, %v351_v17  ;;  %385 = vst.msk [vmem:[#allocation2 + $0xc9] sm:$0xff] %vm225_vm0, %v352_v18  ;;  %v4668_v28 = vld [vmem:[#allocation2 + $0x18] sm:$0xff]  ;;  %v4670_v29 = vld [vmem:[#allocation2 + $0x20] sm:$0xff] }
  0x3b   : > { %386 = vst.msk [vmem:[#allocation2 + $0xd9] sm:$0xff] %vm225_vm0, %v353_v19  ;;  %387 = vst.msk [vmem:[#allocation2 + $0xe1] sm:$0xff] %vm225_vm0, %v354_v20  ;;  %v407_v30 = vld [vmem:[#allocation2 + $0x28] sm:$0x3]  ;;  %v716_v31 = vrot.slane %v4668_v28, 2  ;;  %v717_v32 = vrot.slane %v4670_v29, 2 }
  0x3c   : > { %388 = vst.msk [vmem:[#allocation2 + $0xf1] sm:$0xff] %vm225_vm0, %v355_v21  ;;  %389 = vst.msk [vmem:[#allocation2 + $0xf9] sm:$0xff] %vm225_vm0, %v356_v22  ;;  %v517_v33 = vrot.slane %v4668_v28, 1  ;;  %v518_v34 = vrot.slane %v4670_v29, 1  ;;  %v4679_v35 = vld [vmem:[#allocation2 + $0x38] sm:$0xff]  ;;  %v719_v37 = vrot.slane %v407_v30, 2 }
  0x3d   : > { %390 = vst.msk [vmem:[#allocation2 + $0x109] sm:$0xff] %vm225_vm0, %v357_v23  ;;  %391 = vst.msk [vmem:[#allocation2 + $0x111] sm:$0xff] %vm225_vm0, %v358_v25  ;;  %v520_v38 = vrot.slane %v407_v30, 1  ;;  %v410_v39 = vld [vmem:[#allocation2 + $0x40] sm:$0x3]  ;;  %v4686_v40 = vld [vmem:[#allocation2 + $0x30] sm:$0xff]  ;;  %v718_v41 = vsel %vm710_vm4, %v716_v31, %v717_v32 }
  0x3e   : > { %392 = vst.msk [vmem:[#allocation2 + $0x121] sm:$0xff] %vm225_vm0, %v359_v26  ;;  %393 = vst.msk [vmem:[#allocation2 + $0x129] sm:$0xff] %vm225_vm0, %v360_v27  ;;  %v519_v42 = vsel %vm511_vm5, %v517_v33, %v518_v34  ;;  %805 = vrot.lane.b32.xlu1 %v718_v41, %s4376_s29  ;;  %v523_v43 = vrot.slane %v4679_v35, 1  ;;  %v720_v44 = vsel %vm710_vm4, %v717_v32, %v719_v37  ;;  %v525_v46 = vrot.slane %v410_v39, 1  ;;  %v4706_v53 = vld [vmem:[#allocation2 + $0x50] sm:$0xff]  ;;  %v4708_v55 = vld [vmem:[#allocation2 + $0x48] sm:$0xff] }
  0x3f   : > { %vm4682_vm7 = vmpackc.low %vm1083_vm3, %vm4375_vm6  ;;  %606 = vrot.lane.b32.xlu0 %v519_v42, %s4377_s30  ;;  %v521_v45 = vsel %vm511_vm5, %v518_v34, %v520_v38  ;;  %v522_v47 = vrot.slane %v4686_v40, 1  ;;  %v722_v48 = vrot.slane %v4679_v35, 2  ;;  %v724_v51 = vrot.slane %v410_v39, 2  ;;  %v413_v54 = vld [vmem:[#allocation2 + $0x58] sm:$0x3]  ;;  %394 = vst.msk [vmem:[#allocation2 + $0x139] sm:$0xff] %vm225_vm0, %v361_v61 }
  0x40   : > { %4195 = vmatprep.subr.msk.bf16.mxu0 %vm4682_vm7, %v4193_v24  ;;  %v526_v49 = vsel %vm511_vm5, %v523_v43, %v525_v46  ;;  %v721_v52 = vrot.slane %v4686_v40, 2  ;;  %v528_v56 = vrot.slane %v4706_v53, 1  ;;  %v530_v59 = vrot.slane %v413_v54, 1  ;;  %395 = vst.msk [vmem:[#allocation2 + $0x141] sm:$0xff] %vm225_vm0, %v362_v62  ;;  %396 = vst.msk [vmem:[#allocation2 + $0x151] sm:$0xff] %vm225_vm0, %v363_v63  ;;  %v4734_v10 = vld [vmem:[#allocation2 + $0x68] sm:$0xff] }
  0x41   : > { %4198 = vmatpush3.bf16.msk.msra.mxu0 %vm4682_vm7, %v4193_v24  ;;  %v524_v50 = vsel %vm511_vm5, %v522_v47, %v523_v43  ;;  %v725_v57 = vsel %vm710_vm4, %v722_v48, %v724_v51  ;;  %v527_v60 = vrot.slane %v4708_v55, 1  ;;  %v727_v3 = vrot.slane %v4706_v53, 2  ;;  %397 = vst.msk [vmem:[#allocation2 + $0x159] sm:$0xff] %vm225_vm0, %v364_v1  ;;  %398 = vst.msk [vmem:[#allocation2 + $0x169] sm:$0xff] %vm225_vm0, %v365_v2  ;;  %v416_v12 = vld [vmem:[#allocation2 + $0x70] sm:$0x3] }
  0x42   : > { %807 = vrot.lane.b32.xlu1 %v720_v44, %s4376_s29  ;;  %v723_v58 = vsel %vm710_vm4, %v721_v52, %v722_v48  ;;  %v531_v6 = vsel %vm511_vm5, %v528_v56, %v530_v59  ;;  %v729_v8 = vrot.slane %v413_v54, 2  ;;  %v726_v9 = vrot.slane %v4708_v55, 2  ;;  %399 = vst.msk [vmem:[#allocation2 + $0x171] sm:$0xff] %vm225_vm0, %v366_v4  ;;  %400 = vst.msk [vmem:[#allocation2 + $0x181] sm:$0xff] %vm225_vm0, %v367_v5  ;;  %v4739_v13 = vld [vmem:[#allocation2 + $0x60] sm:$0xff]  ;;  %v4756_v26 = vld [vmem:[#allocation2 + $0x78] sm:$0xff] }
  0x43   : > { %608 = vrot.lane.b32.xlu0 %v521_v45, %s4377_s30  ;;  %v529_v7 = vsel %vm511_vm5, %v527_v60, %v528_v56  ;;  %401 = vst.msk [vmem:[#allocation2 + $0x189] sm:$0xff] %vm225_vm0, %v368_v11  ;;  %v533_v14 = vrot.slane %v4734_v10, 1  ;;  %v535_v17 = vrot.slane %v416_v12, 1  ;;  %v532_v18 = vrot.slane %v4739_v13, 1  ;;  %v4754_v24 = vld [vmem:[#allocation2 + $0x80] sm:$0xff]  ;;  %v4770_v42 = vld [vmem:[#allocation2 + $0x98] sm:$0xff] }
  0x44   : > { %v730_v15 = vsel %vm710_vm4, %v727_v3, %v729_v8  ;;  %v728_v16 = vsel %vm710_vm4, %v726_v9, %v727_v3  ;;  %v732_v19 = vrot.slane %v4734_v10, 2  ;;  %v734_v22 = vrot.slane %v416_v12, 2  ;;  %v419_v25 = vld [vmem:[#allocation2 + $0x88] sm:$0x3]  ;;  %v422_v43 = vld [vmem:[#allocation2 + $0xa0] sm:$0x3] }
  0x45   : > { %v536_v20 = vsel %vm511_vm5, %v533_v14, %v535_v17  ;;  %v534_v21 = vsel %vm511_vm5, %v532_v18, %v533_v14  ;;  %v731_v23 = vrot.slane %v4739_v13, 2  ;;  %v538_v27 = vrot.slane %v4754_v24, 1  ;;  %v4772_v44 = vld [vmem:[#allocation2 + $0x90] sm:$0xff]  ;;  %v4788_v59 = vld [vmem:[#allocation2 + $0xa8] sm:$0xff]  ;;  %v4804_v9 = vld [vmem:[#allocation2 + $0xc0] sm:$0xff] }
  0x46   : > { %612 = vrot.lane.b32.xlu1 %v526_v49, %s4377_s30  ;;  %v735_v30 = vsel %vm710_vm4, %v732_v19, %v734_v22  ;;  %v540_v32 = vrot.slane %v419_v25, 1  ;;  %v537_v33 = vrot.slane %v4756_v26, 1  ;;  %v737_v34 = vrot.slane %v4754_v24, 2  ;;  %v428_v8 = vld [vmem:[#allocation2 + $0xd0] sm:$0x3]  ;;  %v4818_v22 = vld [vmem:[#allocation2 + $0xe0] sm:$0xff] }
  0x47   : > { %610 = vrot.lane.b32.xlu0 %v524_v50, %s4377_s30  ;;  %v733_v31 = vsel %vm710_vm4, %v731_v23, %v732_v19  ;;  %v739_v39 = vrot.slane %v419_v25, 2  ;;  %v736_v41 = vrot.slane %v4756_v26, 2  ;;  %v543_v45 = vrot.slane %v4770_v42, 1  ;;  %v431_v23 = vld [vmem:[#allocation2 + $0xe8] sm:$0x3]  ;;  %v4820_v25 = vld [vmem:[#allocation2 + $0xd8] sm:$0xff] }
  0x48   : > { %v541_v37 = vsel %vm511_vm5, %v538_v27, %v540_v32  ;;  %v539_v38 = vsel %vm511_vm5, %v537_v33, %v538_v27  ;;  %v545_v48 = vrot.slane %v422_v43, 1  ;;  %v542_v49 = vrot.slane %v4772_v44, 1  ;;  %v982_v32 = vld [vmem:[%s6280_s1 + $0x8] sm:$0xf]  ;;  %288 = vst.msk [vmem:[#allocation3 + $0x28] sm:$0x3] %vm284_vm9, %v4374_v0 }
  0x49   : > { %v740_v46 = vsel %vm710_vm4, %v737_v34, %v739_v39  ;;  %v738_v47 = vsel %vm710_vm4, %v736_v41, %v737_v34  ;;  %v742_v50 = vrot.slane %v4770_v42, 2  ;;  %v744_v54 = vrot.slane %v422_v43, 2  ;;  %285 = vst.msk [vmem:[#allocation3 + $0x10] sm:$0x3] %vm284_vm9, %v4374_v0  ;;  %291 = vst.msk [vmem:[#allocation3 + $0x40] sm:$0x3] %vm284_vm9, %v4374_v0 }
  0x4a   : > { %811 = vrot.lane.b32.xlu1 %v725_v57, %s4376_s29  ;;  %v546_v51 = vsel %vm511_vm5, %v543_v45, %v545_v48  ;;  %v544_v52 = vsel %vm511_vm5, %v542_v49, %v543_v45  ;;  %v741_v56 = vrot.slane %v4772_v44, 2  ;;  %v4786_v57 = vld [vmem:[#allocation2 + $0xb0] sm:$0xff]  ;;  %v547_v1 = vrot.slane %v4788_v59, 1  ;;  %v434_v48 = vld [vmem:[#allocation2 + $0x100] sm:$0x3] }
  0x4b   : > { %809 = vrot.lane.b32.xlu0 %v723_v58, %s4376_s29  ;;  %v425_v58 = vld [vmem:[#allocation2 + $0xb8] sm:$0x3]  ;;  %v548_v60 = vrot.slane %v4786_v57, 1  ;;  %v745_v61 = vsel %vm710_vm4, %v742_v50, %v744_v54  ;;  %v747_v2 = vrot.slane %v4786_v57, 2  ;;  %v558_v27 = vrot.slane %v4818_v22, 1  ;;  %v4847_v49 = vld [vmem:[#allocation2 + $0xf0] sm:$0xff] }
  0x4c   : > { %v743_v62 = vsel %vm710_vm4, %v741_v56, %v742_v50  ;;  %v550_v63 = vrot.slane %v425_v58, 1  ;;  %v749_v5 = vrot.slane %v425_v58, 2  ;;  %v757_v39 = vrot.slane %v4818_v22, 2  ;;  %294 = vst.msk [vmem:[#allocation3 + $0x58] sm:$0x3] %vm284_vm9, %v4374_v0 }
  0x4d   : > { %v549_v4 = vsel %vm511_vm5, %v547_v1, %v548_v60  ;;  %v759_v45 = vrot.slane %v431_v23, 2  ;;  %v565_v54 = vrot.slane %v434_v48, 1  ;;  %v562_v56 = vrot.slane %v4847_v49, 1  ;;  %v4861_v1 = vld [vmem:[#allocation2 + $0x110] sm:$0xff]  ;;  %297 = vst.msk [vmem:[#allocation3 + $0x70] sm:$0x3] %vm284_vm9, %v4374_v0 }
  0x4e   : > { %616 = vrot.lane.b32.xlu1 %v531_v6, %s4377_s30  ;;  %v551_v3 = vsel %vm511_vm5, %v548_v60, %v550_v63  ;;  %v746_v6 = vrot.slane %v4788_v59, 2  ;;  %v750_v12 = vsel %vm710_vm4, %v747_v2, %v749_v5  ;;  %v761_v63 = vrot.slane %v4847_v49, 2  ;;  %300 = vst.msk [vmem:[#allocation3 + $0x88] sm:$0x3] %vm284_vm9, %v4374_v0  ;;  %303 = vst.msk [vmem:[#allocation3 + $0xa0] sm:$0x3] %vm284_vm9, %v4374_v0 }
  0x4f   : > { %614 = vrot.lane.b32.xlu0 %v529_v7, %s4377_s30  ;;  %v4802_v7 = vld [vmem:[#allocation2 + $0xc8] sm:$0xff]  ;;  %306 = vst.msk [vmem:[#allocation3 + $0xb8] sm:$0x3] %vm284_vm9, %v4374_v0  ;;  %309 = vst.msk [vmem:[#allocation3 + $0xd0] sm:$0x3] %vm284_vm9, %v4374_v0 }
  0x50   : > { %v553_v11 = vrot.slane %v4802_v7, 1  ;;  %v748_v14 = vsel %vm710_vm4, %v746_v6, %v747_v2  ;;  %v752_v17 = vrot.slane %v4802_v7, 2  ;;  %v437_v2 = vld [vmem:[#allocation2 + $0x118] sm:$0x3]  ;;  %312 = vst.msk [vmem:[#allocation3 + $0xe8] sm:$0x3] %vm284_vm9, %v4374_v0 }
  0x51   : > { %315 = vst.msk [vmem:[#allocation3 + $0x100] sm:$0x3] %vm284_vm9, %v4374_v0  ;;  %318 = vst.msk [vmem:[#allocation3 + $0x118] sm:$0x3] %vm284_vm9, %v4374_v0 }
  0x52   : > { %815 = vrot.lane.b32.xlu1 %v730_v15, %s4376_s29  ;;  %v555_v15 = vrot.slane %v428_v8, 1  ;;  %321 = vst.msk [vmem:[#allocation3 + $0x130] sm:$0x3] %vm284_vm9, %v4374_v0  ;;  %324 = vst.msk [vmem:[#allocation3 + $0x148] sm:$0x3] %vm284_vm9, %v4374_v0 }
  0x53   : > { %813 = vrot.lane.b32.xlu0 %v728_v16, %s4376_s29  ;;  %v552_v16 = vrot.slane %v4804_v9, 1  ;;  %327 = vst.msk [vmem:[#allocation3 + $0x160] sm:$0x3] %vm284_vm9, %v4374_v0  ;;  %330 = vst.msk [vmem:[#allocation3 + $0x178] sm:$0x3] %vm284_vm9, %v4374_v0 }
  0x54   : > { %v556_v18 = vsel %vm511_vm5, %v553_v11, %v555_v15  ;;  %333 = vst.msk [vmem:[#allocation3 + $0x190] sm:$0x3] %vm284_vm9, %v4374_v0  ;;  %336 = vst.msk [vmem:[#allocation3 + $0x1a8] sm:$0x3] %vm284_vm9, %v4374_v0 }
  0x55   : > { %v554_v19 = vsel %vm511_vm5, %v552_v16, %v553_v11  ;;  %v769_v16 = vrot.slane %v437_v2, 2 }
  0x56   : > { %620 = vrot.lane.b32.xlu1 %v536_v20, %s4377_s30  ;;  %v754_v20 = vrot.slane %v428_v8, 2  ;;  %v570_v8 = vrot.slane %v437_v2, 1  ;;  %v4911_v2 = vld [vmem:[#allocation2 + $0x150] sm:$0xff] }
  0x57   : > { %618 = vrot.lane.b32.xlu0 %v534_v21, %s4377_s30  ;;  %v751_v21 = vrot.slane %v4804_v9, 2 }
  0x58   : > { %v755_v33 = vsel %vm710_vm4, %v752_v17, %v754_v20  ;;  %v4879_v20 = vld [vmem:[#allocation2 + $0x120] sm:$0xff] }
  0x59   : > { %v753_v34 = vsel %vm710_vm4, %v751_v21, %v752_v17 }
  0x5a   : > { %819 = vrot.lane.b32.xlu1 %v735_v30, %s4376_s29  ;;  %v560_v30 = vrot.slane %v431_v23, 1 }
  0x5b   : > { %817 = vrot.lane.b32.xlu0 %v733_v31, %s4376_s29  ;;  %v981_v31 = vld [vmem:[%s6280_s1] sm:$0xff] }
  0x5c   : > { %v561_v41 = vsel %vm511_vm5, %v558_v27, %v560_v30 }
  0x5e   : > { %624 = vrot.lane.b32.xlu1 %v541_v37, %s4377_s30  ;;  %v557_v37 = vrot.slane %v4820_v25, 1 }
  0x5f   : > { %622 = vrot.lane.b32.xlu0 %v539_v38, %s4377_s30  ;;  %v4834_v38 = vpack.c.bf16 %v982_v32, %v981_v31  ;;  %v572_v31 = vrot.slane %v4879_v20, 1 }
  0x60   : > { %v559_v43 = vsel %vm511_vm5, %v557_v37, %v558_v27 }
  0x61   : > { %4201 = vmatprep.subr.msk.bf16.mxu0 %vm4682_vm7, %v4834_v38 }
  0x62   : > { %823 = vrot.lane.b32.xlu1 %v740_v46, %s4376_s29  ;;  %v756_v46 = vrot.slane %v4820_v25, 2 }
  0x63   : > { %821 = vrot.lane.b32.xlu0 %v738_v47, %s4376_s29  ;;  %v4845_v47 = vld [vmem:[#allocation2 + $0xf8] sm:$0xff] }
  0x64   : > { %v563_v50 = vrot.slane %v4845_v47, 1  ;;  %v762_v58 = vrot.slane %v4845_v47, 2 }
  0x66   : > { %628 = vrot.lane.b32.xlu1 %v546_v51, %s4377_s30  ;;  %v760_v51 = vsel %vm710_vm4, %v757_v39, %v759_v45  ;;  %v566_v60 = vsel %vm511_vm5, %v563_v50, %v565_v54  ;;  %v763_v6 = vsel %vm710_vm4, %v761_v63, %v762_v58  ;;  %v4895_v45 = vld [vmem:[#allocation2 + $0x138] sm:$0xff]  ;;  %v446_v63 = vld [vmem:[#allocation2 + $0x160] sm:$0x3] }
  0x67   : > { %626 = vrot.lane.b32.xlu0 %v544_v52, %s4377_s30  ;;  %v758_v52 = vsel %vm710_vm4, %v756_v46, %v757_v39  ;;  %v771_v39 = vrot.slane %v4879_v20, 2 }
  0x6a   : > { %827 = vrot.lane.b32.xlu1 %v745_v61, %s4376_s29  ;;  %v564_v61 = vsel %vm511_vm5, %v562_v56, %v563_v50 }
  0x6b   : > { %825 = vrot.lane.b32.xlu0 %v743_v62, %s4376_s29  ;;  %v764_v62 = vrot.slane %v434_v48, 2 }
  0x6d   : > { %v765_v5 = vsel %vm710_vm4, %v762_v58, %v764_v62  ;;  %v4909_v62 = vld [vmem:[#allocation2 + $0x158] sm:$0xff] }
  0x6e   : > { %632 = vrot.lane.b32.xlu1 %v551_v3, %s4377_s30  ;;  %v4863_v3 = vld [vmem:[#allocation2 + $0x108] sm:$0xff] }
  0x6f   : > { %630 = vrot.lane.b32.xlu0 %v549_v4, %s4377_s30  ;;  %v568_v4 = vrot.slane %v4861_v1, 1  ;;  %v567_v11 = vrot.slane %v4863_v3, 1  ;;  %v766_v17 = vrot.slane %v4863_v3, 2 }
  0x71   : > { %v569_v15 = vsel %vm511_vm5, %v567_v11, %v568_v4  ;;  %v582_v11 = vrot.slane %v4911_v2, 1 }
  0x72   : > { %831 = vrot.lane.b32.xlu1 %v750_v12, %s4376_s29  ;;  %v767_v12 = vrot.slane %v4861_v1, 2 }
  0x73   : > { %829 = vrot.lane.b32.xlu0 %v748_v14, %s4376_s29  ;;  %v571_v14 = vsel %vm511_vm5, %v568_v4, %v570_v8  ;;  %v583_v4 = vrot.slane %v4909_v62, 1  ;;  %v585_v8 = vrot.slane %v446_v63, 1 }
  0x74   : > { %v770_v23 = vsel %vm710_vm4, %v767_v12, %v769_v16  ;;  %v768_v27 = vsel %vm710_vm4, %v766_v17, %v767_v12  ;;  %v782_v12 = vrot.slane %v4909_v62, 2  ;;  %v784_v16 = vrot.slane %v446_v63, 2 }
  0x75   : > { %v781_v17 = vrot.slane %v4911_v2, 2 }
  0x76   : > { %636 = vrot.lane.b32.xlu1 %v556_v18, %s4377_s30  ;;  %v4877_v18 = vld [vmem:[#allocation2 + $0x128] sm:$0xff] }
  0x77   : > { %634 = vrot.lane.b32.xlu0 %v554_v19, %s4377_s30  ;;  %v440_v19 = vld [vmem:[#allocation2 + $0x130] sm:$0x3]  ;;  %v573_v21 = vrot.slane %v4877_v18, 1  ;;  %v772_v32 = vrot.slane %v4877_v18, 2 }
  0x78   : > { %v575_v30 = vrot.slane %v440_v19, 1  ;;  %v774_v37 = vrot.slane %v440_v19, 2  ;;  %v4925_v19 = vld [vmem:[#allocation2 + $0x170] sm:$0xff] }
  0x79   : > { %v773_v50 = vsel %vm710_vm4, %v771_v39, %v772_v32 }
  0x7a   : > { %835 = vrot.lane.b32.xlu1 %v755_v33, %s4376_s29  ;;  %v576_v33 = vsel %vm511_vm5, %v573_v21, %v575_v30  ;;  %v775_v48 = vsel %vm710_vm4, %v772_v32, %v774_v37  ;;  %v785_v30 = vsel %vm710_vm4, %v782_v12, %v784_v16 }
  0x7b   : > { %833 = vrot.lane.b32.xlu0 %v753_v34, %s4376_s29  ;;  %v574_v34 = vsel %vm511_vm5, %v572_v31, %v573_v21  ;;  %v449_v21 = vld [vmem:[#allocation2 + $0x178] sm:$0x3]  ;;  %v783_v31 = vsel %vm710_vm4, %v781_v17, %v782_v12 }
  0x7c   : > { %v590_v32 = vrot.slane %v449_v21, 1 }
  0x7e   : > { %640 = vrot.lane.b32.xlu1 %v561_v41, %s4377_s30  ;;  %v4893_v41 = vld [vmem:[#allocation2 + $0x140] sm:$0xff] }
  0x7f   : > { %638 = vrot.lane.b32.xlu0 %v559_v43, %s4377_s30  ;;  %v443_v43 = vld [vmem:[#allocation2 + $0x148] sm:$0x3]  ;;  %v578_v46 = vrot.slane %v4893_v41, 1  ;;  %v777_v54 = vrot.slane %v4893_v41, 2 }
  0x82   : > { %839 = vrot.lane.b32.xlu1 %v760_v51, %s4376_s29  ;;  %v580_v51 = vrot.slane %v443_v43, 1 }
  0x83   : > { %837 = vrot.lane.b32.xlu0 %v758_v52, %s4376_s29  ;;  %v577_v52 = vrot.slane %v4895_v45, 1 }
  0x84   : > { %v581_v56 = vsel %vm511_vm5, %v578_v46, %v580_v51  ;;  %v4943_v51 = vld [vmem:[#allocation2 + $0x180] sm:$0xff] }
  0x85   : > { %v579_v58 = vsel %vm511_vm5, %v577_v52, %v578_v46 }
  0x86   : > { %644 = vrot.lane.b32.xlu1 %v566_v60, %s4377_s30  ;;  %v779_v60 = vrot.slane %v443_v43, 2  ;;  %v789_v43 = vrot.slane %v449_v21, 2  ;;  %v4966_v21 = vld [vmem:[#allocation2] sm:$0xff] }
  0x87   : > { %642 = vrot.lane.b32.xlu0 %v564_v61, %s4377_s30  ;;  %v776_v61 = vrot.slane %v4895_v45, 2 }
  0x8a   : > { %843 = vrot.lane.b32.xlu1 %v765_v5, %s4376_s29  ;;  %v780_v5 = vsel %vm710_vm4, %v777_v54, %v779_v60  ;;  %v592_v60 = vrot.slane %v4943_v51, 1 }
  0x8b   : > { %841 = vrot.lane.b32.xlu0 %v763_v6, %s4376_s29  ;;  %v778_v6 = vsel %vm710_vm4, %v776_v61, %v777_v54 }
  0x8e   : > { %648 = vrot.lane.b32.xlu1 %v571_v14, %s4377_s30  ;;  %v586_v14 = vsel %vm511_vm5, %v583_v4, %v585_v8 }
  0x8f   : > { %646 = vrot.lane.b32.xlu0 %v569_v15, %s4377_s30  ;;  %v584_v15 = vsel %vm511_vm5, %v582_v11, %v583_v4 }
  0x92   : > { %847 = vrot.lane.b32.xlu1 %v770_v23, %s4376_s29  ;;  %v4927_v23 = vld [vmem:[#allocation2 + $0x168] sm:$0xff] }
  0x93   : > { %845 = vrot.lane.b32.xlu0 %v768_v27, %s4376_s29  ;;  %v588_v27 = vrot.slane %v4925_v19, 1  ;;  %v786_v46 = vrot.slane %v4927_v23, 2 }
  0x95   : > { %v591_v37 = vsel %vm511_vm5, %v588_v27, %v590_v32 }
  0x96   : > { %652 = vrot.lane.b32.xlu1 %v576_v33, %s4377_s30  ;;  %v587_v33 = vrot.slane %v4927_v23, 1 }
  0x97   : > { %650 = vrot.lane.b32.xlu0 %v574_v34, %s4377_s30  ;;  %v787_v34 = vrot.slane %v4925_v19, 2 }
  0x98   : > { %v589_v39 = vsel %vm511_vm5, %v587_v33, %v588_v27  ;;  %v3525_v33 = vld [vmem:[%s6280_s1 + $0x20] sm:$0xff] }
  0x99   : > { %v790_v54 = vsel %vm710_vm4, %v787_v34, %v789_v43 }
  0x9a   : > { %851 = vrot.lane.b32.xlu1 %v775_v48, %s4376_s29  ;;  %v4941_v48 = vld [vmem:[#allocation2 + $0x188] sm:$0xff] }
  0x9b   : > { %849 = vrot.lane.b32.xlu0 %v773_v50, %s4376_s29  ;;  %v452_v50 = vld [vmem:[#allocation2 + $0x190] sm:$0x3]  ;;  %v593_v52 = vrot.slane %v4941_v48, 1 }
  0x9c   : > { %v794_v12 = vrot.slane %v452_v50, 2 }
  0x9d   : > { %v594_v11 = vsel %vm511_vm5, %v592_v60, %v593_v52  ;;  %v711_v60 = vrot.slane %v4966_v21, 2 }
  0x9e   : > { %656 = vrot.lane.b32.xlu1 %v581_v56, %s4377_s30  ;;  %v788_v56 = vsel %vm710_vm4, %v786_v46, %v787_v34  ;;  %v3526_v34 = vld [vmem:[%s6280_s1 + $0x28] sm:$0xf] }
  0x9f   : > { %654 = vrot.lane.b32.xlu0 %v579_v58, %s4377_s30  ;;  %v595_v58 = vrot.slane %v452_v50, 1  ;;  %v4987_v43 = vpack.c.bf16 %v3526_v34, %v3525_v33 }
  0xa1   : > { %v596_v8 = vsel %vm511_vm5, %v593_v52, %v595_v58 }
  0xa2   : > { %855 = vrot.lane.b32.xlu1 %v780_v5, %s4376_s29 }
  0xa3   : > { %853 = vrot.lane.b32.xlu0 %v778_v6, %s4376_s29  ;;  %v792_v6 = vrot.slane %v4941_v48, 2 }
  0xa6   : > { %660 = vrot.lane.b32.xlu1 %v586_v14, %s4377_s30  ;;  %v791_v14 = vrot.slane %v4943_v51, 2 }
  0xa7   : > { %658 = vrot.lane.b32.xlu0 %v584_v15, %s4377_s30  ;;  %v404_v15 = vld [vmem:[#allocation2 + $0x10] sm:$0x3] }
  0xa8   : > { %v515_v32 = vrot.slane %v404_v15, 1  ;;  %v714_v58 = vrot.slane %v404_v15, 2 }
  0xaa   : > { %859 = vrot.lane.b32.xlu1 %v785_v30, %s4376_s29 }
  0xab   : > { %857 = vrot.lane.b32.xlu0 %v783_v31, %s4376_s29 }
  0xae   : > { %664 = vrot.lane.b32.xlu1 %v591_v37, %s4377_s30  ;;  %v793_v37 = vsel %vm710_vm4, %v791_v14, %v792_v6  ;;  %v455_v14 = vld [vmem:[#allocation2 + $0x1a8] sm:$0x3] }
  0xaf   : > { %662 = vrot.lane.b32.xlu0 %v589_v39, %s4377_s30  ;;  %v512_v39 = vrot.slane %v4966_v21, 1 }
  0xb0   : > { %v806_v61 = vpop.permute.xlu1 %805 }
  0xb1   : > { %v607_v63 = vpop.permute.xlu0 %606 }
  0xb2   : > { %v911_v4 = vsel %vm225_vm0, %v4668_v28, %v607_v63  ;;  %863 = vrot.lane.b32.xlu1 %v790_v54, %s4376_s29  ;;  %v4964_v28 = vld [vmem:[#allocation2 + $0x8] sm:$0xff] }
  0xb3   : > { %861 = vrot.lane.b32.xlu0 %v788_v56, %s4376_s29  ;;  %v4956_v5 = vsel %vm281_vm2, %v911_v4, %v806_v61  ;;  %v513_v31 = vrot.slane %v4964_v28, 1  ;;  %v712_v52 = vrot.slane %v4964_v28, 2 }
  0xb4   : > { %3879 = vmatprep.mubr.msk.f32.mxu0 %vm986_vm8, %v4956_v5  ;;  %v808_v16 = vpop.permute.xlu1 %807 }
  0xb5   : > { %v609_v17 = vpop.permute.xlu0 %608  ;;  %v516_v54 = vsel %vm511_vm5, %v513_v31, %v515_v32  ;;  %v514_v56 = vsel %vm511_vm5, %v512_v39, %v513_v31  ;;  %v600_v31 = vrot.slane %v455_v14, 1 }
  0xb6   : > { %v912_v27 = vsel %vm225_vm0, %v4670_v29, %v609_v17  ;;  %668 = vrot.lane.b32.xlu1 %v596_v8, %s4377_s30  ;;  %v795_v29 = vsel %vm710_vm4, %v792_v6, %v794_v12  ;;  %v5005_v6 = vld [vmem:[#allocation2 + $0x198] sm:$0xff]  ;;  %v5007_v8 = vld [vmem:[#allocation2 + $0x1a0] sm:$0xff] }
  0xb7   : > { %666 = vrot.lane.b32.xlu0 %v594_v11, %s4377_s30  ;;  %v4973_v30 = vsel %vm281_vm2, %v912_v27, %v808_v16  ;;  %v597_v15 = vrot.slane %v5005_v6, 1  ;;  %v598_v16 = vrot.slane %v5007_v8, 1  ;;  %v796_v33 = vrot.slane %v5005_v6, 2 }
  0xb8   : > { %3880 = vmatmul.mubr.msk.f32.vlgmr.msra.gmra.mrb[0].mxu0 %vm986_vm8, %v4973_v30  ;;  %v613_v46 = vpop.permute.xlu1 %612  ;;  %v797_v34 = vrot.slane %v5007_v8, 2 }
  0xb9   : > { %v611_v50 = vpop.permute.xlu0 %610  ;;  %4204 = vmatpush3.bf16.msk.msra.mxu0 %vm4682_vm7, %v4834_v38  ;;  %v914_v38 = vsel %vm225_vm0, %v4679_v35, %v613_v46  ;;  %v715_v35 = vsel %vm710_vm4, %v712_v52, %v714_v58  ;;  %v599_v32 = vsel %vm511_vm5, %v597_v15, %v598_v16 }
  0xba   : > { %4207 = vmatprep.subr.msk.bf16.mxu0 %vm4682_vm7, %v4987_v43  ;;  %867 = vrot.lane.b32.xlu1 %v795_v29, %s4376_s29  ;;  %v913_v61 = vsel %vm225_vm0, %v4686_v40, %v611_v50  ;;  %v713_v40 = vsel %vm710_vm4, %v711_v60, %v712_v52  ;;  %v601_v50 = vsel %vm511_vm5, %v598_v16, %v600_v31  ;;  %v799_v52 = vrot.slane %v455_v14, 2 }
  0xbb   : > { %865 = vrot.lane.b32.xlu0 %v793_v37, %s4376_s29 }
  0xbc   : > { %v812_v63 = vpop.permute.xlu1 %811  ;;  %v800_v60 = vsel %vm710_vm4, %v797_v34, %v799_v52 }
  0xbd   : > { %v810_v4 = vpop.permute.xlu0 %809  ;;  %v5010_v11 = vsel %vm281_vm2, %v914_v38, %v812_v63 }
  0xbe   : > { %v5013_v12 = vsel %vm281_vm2, %v913_v61, %v810_v4  ;;  %604 = vrot.lane.b32.xlu1 %v516_v54, %s4377_s30 }
  0xbf   : > { %602 = vrot.lane.b32.xlu0 %v514_v56, %s4377_s30  ;;  %3882 = vmatprep.mubr.msk.f32.mxu0 %vm986_vm8, %v5013_v12 }
  0xc0   : > { %3883 = vmatmul.mubr.msk.f32.gmra.mrb[2].mxu0 %vm986_vm8, %v5010_v11  ;;  %v617_v17 = vpop.permute.xlu1 %616 }
  0xc1   : > { %v615_v27 = vpop.permute.xlu0 %614  ;;  %v916_v29 = vsel %vm225_vm0, %v4706_v53, %v617_v17  ;;  %v798_v53 = vsel %vm710_vm4, %v796_v33, %v797_v34 }
  0xc2   : > { %803 = vrot.lane.b32.xlu1 %v715_v35, %s4376_s29  ;;  %v915_v37 = vsel %vm225_vm0, %v4708_v55, %v615_v27 }
  0xc3   : > { %801 = vrot.lane.b32.xlu0 %v713_v40, %s4376_s29 }
  0xc4   : > { %v816_v39 = vpop.permute.xlu1 %815 }
  0xc5   : > { %v814_v46 = vpop.permute.xlu0 %813  ;;  %v5036_v54 = vsel %vm281_vm2, %v916_v29, %v816_v39 }
  0xc6   : > { %v5039_v56 = vsel %vm281_vm2, %v915_v37, %v814_v46  ;;  %672 = vrot.lane.b32.xlu1 %v601_v50, %s4377_s30 }
  0xc7   : > { %3885 = vmatprep.mubr.msk.f32.mxu0 %vm986_vm8, %v5039_v56  ;;  %670 = vrot.lane.b32.xlu0 %v599_v32, %s4377_s30 }
  0xc8   : > { %3886 = vmatmul.mubr.msk.f32.gmra.mrb[4].mxu0 %vm986_vm8, %v5036_v54  ;;  %v621_v55 = vpop.permute.xlu1 %620 }
  0xc9   : > { %v619_v58 = vpop.permute.xlu0 %618  ;;  %v918_v38 = vsel %vm225_vm0, %v4734_v10, %v621_v55 }
  0xca   : > { %871 = vrot.lane.b32.xlu1 %v800_v60, %s4376_s29  ;;  %v917_v61 = vsel %vm225_vm0, %v4739_v13, %v619_v58 }
  0xcb   : > { %869 = vrot.lane.b32.xlu0 %v798_v53, %s4376_s29 }
  0xcc   : > { %v820_v63 = vpop.permute.xlu1 %819 }
  0xcd   : > { %v818_v4 = vpop.permute.xlu0 %817  ;;  %v5056_v14 = vsel %vm281_vm2, %v918_v38, %v820_v63 }
  0xce   : > { %v5059_v35 = vsel %vm281_vm2, %v917_v61, %v818_v4 }
  0xcf   : > { %3888 = vmatprep.mubr.msk.f32.mxu0 %vm986_vm8, %v5059_v35 }
  0xd0   : > { %3889 = vmatmul.mubr.msk.f32.gmra.mrb[6].mxu0 %vm986_vm8, %v5056_v14  ;;  %v625_v40 = vpop.permute.xlu1 %624 }
  0xd1   : > { %v623_v15 = vpop.permute.xlu0 %622  ;;  %v920_v10 = vsel %vm225_vm0, %v4754_v24, %v625_v40 }
  0xd2   : > { %v919_v13 = vsel %vm225_vm0, %v4756_v26, %v623_v15 }
  0xd4   : > { %v824_v16 = vpop.permute.xlu1 %823 }
  0xd5   : > { %v822_v17 = vpop.permute.xlu0 %821  ;;  %v5070_v27 = vsel %vm281_vm2, %v920_v10, %v824_v16 }
  0xd6   : > { %v5073_v31 = vsel %vm281_vm2, %v919_v13, %v822_v17 }
  0xd7   : > { %3891 = vmatprep.mubr.msk.f32.mxu0 %vm986_vm8, %v5073_v31 }
  0xd8   : > { %3892 = vmatmul.mubr.msk.f32.gmra.mrb[8].mxu0 %vm986_vm8, %v5070_v27  ;;  %v629_v32 = vpop.permute.xlu1 %628 }
  0xd9   : > { %v627_v33 = vpop.permute.xlu0 %626  ;;  %v922_v24 = vsel %vm225_vm0, %v4770_v42, %v629_v32 }
  0xda   : > { %v921_v26 = vsel %vm225_vm0, %v4772_v44, %v627_v33 }
  0xdc   : > { %v828_v34 = vpop.permute.xlu1 %827 }
  0xdd   : > { %v826_v29 = vpop.permute.xlu0 %825  ;;  %v5084_v37 = vsel %vm281_vm2, %v922_v24, %v828_v34 }
  0xde   : > { %v5087_v39 = vsel %vm281_vm2, %v921_v26, %v826_v29 }
  0xdf   : > { %3894 = vmatprep.mubr.msk.f32.mxu0 %vm986_vm8, %v5087_v39 }
  0xe0   : > { %3895 = vmatmul.mubr.msk.f32.gmra.mrb[10].mxu0 %vm986_vm8, %v5084_v37  ;;  %v633_v46 = vpop.permute.xlu1 %632 }
  0xe1   : > { %v631_v50 = vpop.permute.xlu0 %630  ;;  %v924_v42 = vsel %vm225_vm0, %v4786_v57, %v633_v46 }
  0xe2   : > { %v923_v44 = vsel %vm225_vm0, %v4788_v59, %v631_v50 }
  0xe4   : > { %v832_v52 = vpop.permute.xlu1 %831 }
  0xe5   : > { %v830_v53 = vpop.permute.xlu0 %829  ;;  %v5098_v55 = vsel %vm281_vm2, %v924_v42, %v832_v52 }
  0xe6   : > { %v5101_v58 = vsel %vm281_vm2, %v923_v44, %v830_v53 }
  0xe7   : > { %3897 = vmatprep.mubr.msk.f32.mxu0 %vm986_vm8, %v5101_v58 }
  0xe8   : > { %3898 = vmatmul.mubr.msk.f32.gmra.mrb[12].mxu0 %vm986_vm8, %v5098_v55  ;;  %v637_v60 = vpop.permute.xlu1 %636 }
  0xe9   : > { %v635_v38 = vpop.permute.xlu0 %634  ;;  %v926_v57 = vsel %vm225_vm0, %v4802_v7, %v637_v60 }
  0xea   : > { %v925_v59 = vsel %vm225_vm0, %v4804_v9, %v635_v38 }
  0xec   : > { %v836_v61 = vpop.permute.xlu1 %835 }
  0xed   : > { %v834_v63 = vpop.permute.xlu0 %833  ;;  %v5112_v4 = vsel %vm281_vm2, %v926_v57, %v836_v61 }
  0xee   : > { %v5115_v40 = vsel %vm281_vm2, %v925_v59, %v834_v63 }
  0xef   : > { %3900 = vmatprep.mubr.msk.f32.mxu0 %vm986_vm8, %v5115_v40 }
  0xf0   : > { %3901 = vmatmul.mubr.msk.f32.gmra.mrb[14].mxu0 %vm986_vm8, %v5112_v4  ;;  %v641_v15 = vpop.permute.xlu1 %640 }
  0xf1   : > { %v639_v10 = vpop.permute.xlu0 %638  ;;  %v928_v7 = vsel %vm225_vm0, %v4818_v22, %v641_v15 }
  0xf2   : > { %v927_v9 = vsel %vm225_vm0, %v4820_v25, %v639_v10 }
  0xf4   : > { %v840_v13 = vpop.permute.xlu1 %839 }
  0xf5   : > { %v838_v16 = vpop.permute.xlu0 %837  ;;  %v5126_v17 = vsel %vm281_vm2, %v928_v7, %v840_v13 }
  0xf6   : > { %v5129_v32 = vsel %vm281_vm2, %v927_v9, %v838_v16 }
  0xf7   : > { %3903 = vmatprep.mubr.msk.f32.mxu0 %vm986_vm8, %v5129_v32 }
  0xf8   : > { %3904 = vmatmul.mubr.msk.f32.gmra.mrb[16].mxu0 %vm986_vm8, %v5126_v17  ;;  %v645_v33 = vpop.permute.xlu1 %644 }
  0xf9   : > { %v643_v24 = vpop.permute.xlu0 %642  ;;  %v930_v22 = vsel %vm225_vm0, %v4845_v47, %v645_v33 }
  0xfa   : > { %v929_v25 = vsel %vm225_vm0, %v4847_v49, %v643_v24 }
  0xfc   : > { %v844_v26 = vpop.permute.xlu1 %843 }
  0xfd   : > { %v842_v34 = vpop.permute.xlu0 %841  ;;  %v5140_v29 = vsel %vm281_vm2, %v930_v22, %v844_v26 }
  0xfe   : > { %v5143_v46 = vsel %vm281_vm2, %v929_v25, %v842_v34 }
  0xff   : > { %3906 = vmatprep.mubr.msk.f32.mxu0 %vm986_vm8, %v5143_v46 }
 0x100   : > { %3907 = vmatmul.mubr.msk.f32.gmra.mrb[18].mxu0 %vm986_vm8, %v5140_v29  ;;  %v649_v50 = vpop.permute.xlu1 %648 }
 0x101   : > { %v647_v42 = vpop.permute.xlu0 %646  ;;  %v932_v47 = vsel %vm225_vm0, %v4861_v1, %v649_v50 }
 0x102   : > { %v931_v49 = vsel %vm225_vm0, %v4863_v3, %v647_v42 }
 0x104   : > { %v848_v44 = vpop.permute.xlu1 %847 }
 0x105   : > { %v846_v52 = vpop.permute.xlu0 %845  ;;  %v5154_v53 = vsel %vm281_vm2, %v932_v47, %v848_v44 }
 0x106   : > { %v5157_v60 = vsel %vm281_vm2, %v931_v49, %v846_v52 }
 0x107   : > { %3909 = vmatprep.mubr.msk.f32.mxu0 %vm986_vm8, %v5157_v60 }
 0x108   : > { %3910 = vmatmul.mubr.msk.f32.gmra.mrb[20].mxu0 %vm986_vm8, %v5154_v53  ;;  %v653_v38 = vpop.permute.xlu1 %652 }
 0x109   : > { %v651_v57 = vpop.permute.xlu0 %650  ;;  %v934_v1 = vsel %vm225_vm0, %v4877_v18, %v653_v38 }
 0x10a   : > { %v933_v3 = vsel %vm225_vm0, %v4879_v20, %v651_v57 }
 0x10c   : > { %v852_v59 = vpop.permute.xlu1 %851 }
 0x10d   : > { %v850_v61 = vpop.permute.xlu0 %849  ;;  %v5168_v63 = vsel %vm281_vm2, %v934_v1, %v852_v59 }
 0x10e   : > { %v5171_v15 = vsel %vm281_vm2, %v933_v3, %v850_v61 }
 0x10f   : > { %3912 = vmatprep.mubr.msk.f32.mxu0 %vm986_vm8, %v5171_v15 }
 0x110   : > { %3913 = vmatmul.mubr.msk.f32.gmra.mrb[22].mxu0 %vm986_vm8, %v5168_v63  ;;  %v657_v10 = vpop.permute.xlu1 %656 }
 0x111   : > { %v655_v7 = vpop.permute.xlu0 %654  ;;  %v936_v18 = vsel %vm225_vm0, %v4893_v41, %v657_v10 }
 0x112   : > { %v935_v20 = vsel %vm225_vm0, %v4895_v45, %v655_v7 }
 0x114   : > { %v856_v9 = vpop.permute.xlu1 %855 }
 0x115   : > { %v854_v13 = vpop.permute.xlu0 %853  ;;  %v5182_v16 = vsel %vm281_vm2, %v936_v18, %v856_v9 }
 0x116   : > { %v5185_v33 = vsel %vm281_vm2, %v935_v20, %v854_v13 }
 0x117   : > { %3915 = vmatprep.mubr.msk.f32.mxu0 %vm986_vm8, %v5185_v33 }
 0x118   : > { %3916 = vmatmul.mubr.msk.f32.gmra.mrb[24].mxu0 %vm986_vm8, %v5182_v16  ;;  %v661_v24 = vpop.permute.xlu1 %660 }
 0x119   : > { %v659_v22 = vpop.permute.xlu0 %658  ;;  %v938_v41 = vsel %vm225_vm0, %v4909_v62, %v661_v24 }
 0x11a   : > { %v937_v45 = vsel %vm225_vm0, %v4911_v2, %v659_v22  ;;  %v3563_v22 = vld [vmem:[%s6282_s3 + $0x28] sm:$0xff] }
 0x11c   : > { %v860_v25 = vpop.permute.xlu1 %859 }
 0x11d   : > { %v858_v26 = vpop.permute.xlu0 %857  ;;  %v5196_v34 = vsel %vm281_vm2, %v938_v41, %v860_v25 }
 0x11e   : > { %v5199_v50 = vsel %vm281_vm2, %v937_v45, %v858_v26 }
 0x11f   : > { %3918 = vmatprep.mubr.msk.f32.mxu0 %vm986_vm8, %v5199_v50 }
 0x120   : > { %3919 = vmatmul.mubr.msk.f32.gmra.mrb[26].mxu0 %vm986_vm8, %v5196_v34  ;;  %v665_v42 = vpop.permute.xlu1 %664 }
 0x121   : > { %v663_v47 = vpop.permute.xlu0 %662  ;;  %v940_v62 = vsel %vm225_vm0, %v4925_v19, %v665_v42 }
 0x122   : > { %v939_v2 = vsel %vm225_vm0, %v4927_v23, %v663_v47 }
 0x124   : > { %v864_v49 = vpop.permute.xlu1 %863 }
 0x125   : > { %v862_v44 = vpop.permute.xlu0 %861  ;;  %v5210_v52 = vsel %vm281_vm2, %v940_v62, %v864_v49 }
 0x126   : > { %v5213_v38 = vsel %vm281_vm2, %v939_v2, %v862_v44 }
 0x127   : > { %3921 = vmatprep.mubr.msk.f32.mxu0 %vm986_vm8, %v5213_v38 }
 0x128   : > { %3922 = vmatmul.mubr.msk.f32.gmra.mrb[28].mxu0 %vm986_vm8, %v5210_v52  ;;  %v669_v57 = vpop.permute.xlu1 %668 }
 0x129   : > { %v667_v1 = vpop.permute.xlu0 %666  ;;  %v942_v19 = vsel %vm225_vm0, %v4941_v48, %v669_v57 }
 0x12a   : > { %v941_v23 = vsel %vm225_vm0, %v4943_v51, %v667_v1 }
 0x12c   : > { %v868_v3 = vpop.permute.xlu1 %867 }
 0x12d   : > { %v866_v59 = vpop.permute.xlu0 %865  ;;  %v5224_v61 = vsel %vm281_vm2, %v942_v19, %v868_v3 }
 0x12e   : > { %v5227_v10 = vsel %vm281_vm2, %v941_v23, %v866_v59 }
 0x12f   : > { %3924 = vmatprep.mubr.msk.f32.mxu0 %vm986_vm8, %v5227_v10 }
 0x130   : > { %3925 = vmatmul.mubr.msk.f32.gmra.mrb[30].mxu0 %vm986_vm8, %v5224_v61  ;;  %v605_v7 = vpop.permute.xlu1 %604 }
 0x131   : > { %v603_v18 = vpop.permute.xlu0 %602  ;;  %v910_v48 = vsel %vm225_vm0, %v4964_v28, %v605_v7 }
 0x132   : > { %v909_v51 = vsel %vm225_vm0, %v4966_v21, %v603_v18 }
 0x134   : > { %v804_v20 = vpop.permute.xlu1 %803 }
 0x135   : > { %v802_v9 = vpop.permute.xlu0 %801  ;;  %v946_v28 = vsel %vm281_vm2, %v910_v48, %v804_v20 }
 0x136   : > { %v945_v21 = vsel %vm281_vm2, %v909_v51, %v802_v9 }
 0x137   : > { %3931 = vmatprep.mubr.msk.f32.mxu0 %vm986_vm8, %v945_v21 }
 0x138   : > { %3932 = vmatmul.mubr.msk.f32.vlgmr.msra.gmra.mrb[0].mxu0 %vm986_vm8, %v946_v28  ;;  %v673_v36 = vpop.permute.xlu1 %672 }
 0x139   : > { %4210 = vmatpush3.bf16.msk.msra.mxu0 %vm4682_vm7, %v4987_v43  ;;  %3934 = vmatprep.mubr.msk.f32.mxu0 %vm986_vm8, %v4956_v5  ;;  %v671_v0 = vpop.permute.xlu0 %670  ;;  %v944_v43 = vsel %vm225_vm0, %v5007_v8, %v673_v36 }
 0x13a   : > { %v943_v5 = vsel %vm225_vm0, %v5005_v6, %v671_v0  ;;  %v5408_v6 = vld [vmem:[#allocation3 + $0x8] sm:$0xff] }
 0x13b   : > { %v2028_v8 = vrot.slane %v5408_v6, 1 }
 0x13c   : > { %3935 = vmatmul.mubr.msk.f32.gmra.mrb[2].mxu0 %vm986_vm8, %v4973_v30 }
 0x13d   : > { %3937 = vmatprep.mubr.msk.f32.mxu0 %vm986_vm8, %v5013_v12  ;;  %v870_v30 = vpop.permute.xlu0 %869 }
 0x140   : > { %3938 = vmatmul.mubr.msk.f32.gmra.mrb[4].mxu0 %vm986_vm8, %v5010_v11 }
 0x141   : > { %3940 = vmatprep.mubr.msk.f32.mxu0 %vm986_vm8, %v5039_v56 }
 0x144   : > { %3941 = vmatmul.mubr.msk.f32.gmra.mrb[6].mxu0 %vm986_vm8, %v5036_v54 }
 0x145   : > { %3943 = vmatprep.mubr.msk.f32.mxu0 %vm986_vm8, %v5059_v35 }
 0x148   : > { %3944 = vmatmul.mubr.msk.f32.gmra.mrb[8].mxu0 %vm986_vm8, %v5056_v14 }
 0x149   : > { %3946 = vmatprep.mubr.msk.f32.mxu0 %vm986_vm8, %v5073_v31 }
 0x14c   : > { %3947 = vmatmul.mubr.msk.f32.gmra.mrb[10].mxu0 %vm986_vm8, %v5070_v27 }
 0x14d   : > { %3949 = vmatprep.mubr.msk.f32.mxu0 %vm986_vm8, %v5087_v39 }
 0x150   : > { %3950 = vmatmul.mubr.msk.f32.gmra.mrb[12].mxu0 %vm986_vm8, %v5084_v37 }
 0x151   : > { %3952 = vmatprep.mubr.msk.f32.mxu0 %vm986_vm8, %v5101_v58 }
 0x154   : > { %3953 = vmatmul.mubr.msk.f32.gmra.mrb[14].mxu0 %vm986_vm8, %v5098_v55 }
 0x155   : > { %3955 = vmatprep.mubr.msk.f32.mxu0 %vm986_vm8, %v5115_v40 }
 0x158   : > { %3956 = vmatmul.mubr.msk.f32.gmra.mrb[16].mxu0 %vm986_vm8, %v5112_v4 }
 0x159   : > { %3958 = vmatprep.mubr.msk.f32.mxu0 %vm986_vm8, %v5129_v32 }
 0x15c   : > { %3959 = vmatmul.mubr.msk.f32.gmra.mrb[18].mxu0 %vm986_vm8, %v5126_v17 }
 0x15d   : > { %3961 = vmatprep.mubr.msk.f32.mxu0 %vm986_vm8, %v5143_v46 }
 0x160   : > { %3962 = vmatmul.mubr.msk.f32.gmra.mrb[20].mxu0 %vm986_vm8, %v5140_v29 }
 0x161   : > { %3964 = vmatprep.mubr.msk.f32.mxu0 %vm986_vm8, %v5157_v60 }
 0x164   : > { %3965 = vmatmul.mubr.msk.f32.gmra.mrb[22].mxu0 %vm986_vm8, %v5154_v53 }
 0x165   : > { %3967 = vmatprep.mubr.msk.f32.mxu0 %vm986_vm8, %v5171_v15 }
 0x168   : > { %3968 = vmatmul.mubr.msk.f32.gmra.mrb[24].mxu0 %vm986_vm8, %v5168_v63 }
 0x169   : > { %3970 = vmatprep.mubr.msk.f32.mxu0 %vm986_vm8, %v5185_v33 }
 0x16c   : > { %3971 = vmatmul.mubr.msk.f32.gmra.mrb[26].mxu0 %vm986_vm8, %v5182_v16 }
 0x16d   : > { %3973 = vmatprep.mubr.msk.f32.mxu0 %vm986_vm8, %v5199_v50 }
 0x170   : > { %3974 = vmatmul.mubr.msk.f32.gmra.mrb[28].mxu0 %vm986_vm8, %v5196_v34 }
 0x171   : > { %3976 = vmatprep.mubr.msk.f32.mxu0 %vm986_vm8, %v5213_v38 }
 0x174   : > { %3977 = vmatmul.mubr.msk.f32.gmra.mrb[30].mxu0 %vm986_vm8, %v5210_v52 }
 0x175   : > { %3983 = vmatprep.mubr.msk.f32.mxu0 %vm986_vm8, %v5013_v12  ;;  %v872_v12 = vpop.permute.xlu1 %871 }
 0x178   : > { %3984 = vmatmul.mubr.msk.f32.vlgmr.msra.gmra.mrb[0].mxu0 %vm986_vm8, %v5010_v11  ;;  %v979_v11 = vsel %vm281_vm2, %v943_v5, %v870_v30 }
 0x179   : > { %3986 = vmatprep.mubr.msk.f32.mxu0 %vm986_vm8, %v5039_v56  ;;  %v5410_v56 = vld [vmem:[#allocation3 + $0x10] sm:$0x3] }
 0x17c   : > { %3987 = vmatmul.mubr.msk.f32.gmra.mrb[2].mxu0 %vm986_vm8, %v5036_v54  ;;  %v980_v54 = vsel %vm281_vm2, %v944_v43, %v872_v12 }
 0x17d   : > { %3989 = vmatprep.mubr.msk.f32.mxu0 %vm986_vm8, %v5059_v35  ;;  %v2030_v35 = vrot.slane %v5410_v56, 1 }
 0x180   : > { %3990 = vmatmul.mubr.msk.f32.gmra.mrb[4].mxu0 %vm986_vm8, %v5056_v14  ;;  %v5412_v14 = vld [vmem:[#allocation3] sm:$0xff] }
 0x181   : > { %3992 = vmatprep.mubr.msk.f32.mxu0 %vm986_vm8, %v5073_v31  ;;  %v2031_v31 = vsel %vm511_vm5, %v2028_v8, %v2030_v35 }
 0x182   : > { %2119 = vrot.lane.b32.xlu1 %v2031_v31, %s4376_s29 }
 0x184   : > { %3993 = vmatmul.mubr.msk.f32.gmra.mrb[6].mxu0 %vm986_vm8, %v5070_v27  ;;  %v2027_v27 = vrot.slane %v5412_v14, 1 }
 0x185   : > { %3995 = vmatprep.mubr.msk.f32.mxu0 %vm986_vm8, %v5087_v39  ;;  %v5424_v39 = vld [vmem:[%s6281_s2] ss:$0 sm:$0xff] }
 0x188   : > { %3996 = vmatmul.mubr.msk.f32.gmra.mrb[8].mxu0 %vm986_vm8, %v5084_v37  ;;  %v2029_v37 = vsel %vm511_vm5, %v2027_v27, %v2028_v8 }
 0x189   : > { %3998 = vmatprep.mubr.msk.f32.mxu0 %vm986_vm8, %v5101_v58  ;;  %2117 = vrot.lane.b32.xlu0 %v2029_v37, %s4376_s29 }
 0x18c   : > { %3999 = vmatmul.mubr.msk.f32.gmra.mrb[10].mxu0 %vm986_vm8, %v5098_v55 }
 0x18d   : > { %4001 = vmatprep.mubr.msk.f32.mxu0 %vm986_vm8, %v5115_v40 }
 0x190   : > { %4002 = vmatmul.mubr.msk.f32.gmra.mrb[12].mxu0 %vm986_vm8, %v5112_v4 }
 0x191   : > { %4004 = vmatprep.mubr.msk.f32.mxu0 %vm986_vm8, %v5129_v32  ;;  %v3562_v32 = vld [vmem:[%s6282_s3 + $0x20] sm:$0xff] }
 0x194   : > { %4005 = vmatmul.mubr.msk.f32.gmra.mrb[14].mxu0 %vm986_vm8, %v5126_v17  ;;  %v3561_v17 = vld [vmem:[%s6282_s3 + $0x18] sm:$0xff] }
 0x195   : > { %4007 = vmatprep.mubr.msk.f32.mxu0 %vm986_vm8, %v5143_v46  ;;  %v4211_v46 = vpack.c.bf16 %v3562_v32, %v3561_v17 }
 0x197   : > { %4212 = vmatprep.subr.bf16.mxu1 %v4211_v46 }
 0x198   : > { %4008 = vmatmul.mubr.msk.f32.gmra.mrb[16].mxu0 %vm986_vm8, %v5140_v29  ;;  %4214 = vmatpush3.bf16.msra.mxu1 %v4211_v46 }
 0x199   : > { %4010 = vmatprep.mubr.msk.f32.mxu0 %vm986_vm8, %v5157_v60  ;;  %4035 = vmatprep.subr.mxu1 %v3563_v22 }
 0x19c   : > { %4011 = vmatmul.mubr.msk.f32.gmra.mrb[18].mxu0 %vm986_vm8, %v5154_v53  ;;  %4036 = vmatpush3.msra.mxu1 %v3563_v22 }
 0x19d   : > { %4013 = vmatprep.mubr.msk.f32.mxu0 %vm986_vm8, %v5171_v15 }
 0x1a0   : > { %4014 = vmatmul.mubr.msk.f32.gmra.mrb[20].mxu0 %vm986_vm8, %v5168_v63 }
 0x1a1   : > { %4016 = vmatprep.mubr.msk.f32.mxu0 %vm986_vm8, %v5185_v33 }
 0x1a4   : > { %4017 = vmatmul.mubr.msk.f32.gmra.mrb[22].mxu0 %vm986_vm8, %v5182_v16 }
 0x1a5   : > { %4019 = vmatprep.mubr.msk.f32.mxu0 %vm986_vm8, %v5199_v50 }
 0x1a8   : > { %4020 = vmatmul.mubr.msk.f32.gmra.mrb[24].mxu0 %vm986_vm8, %v5196_v34 }
 0x1a9   : > { %4022 = vmatprep.mubr.msk.f32.mxu0 %vm986_vm8, %v5213_v38 }
 0x1ac   : > { %4023 = vmatmul.mubr.msk.f32.gmra.mrb[26].mxu0 %vm986_vm8, %v5210_v52 }
 0x1ad   : > { %4025 = vmatprep.mubr.msk.f32.mxu0 %vm986_vm8, %v5227_v10 }
 0x1b0   : > { %4026 = vmatmul.mubr.msk.f32.gmra.mrb[28].mxu0 %vm986_vm8, %v5224_v61 }
 0x1b1   : > { %4028 = vmatprep.mubr.msk.f32.mxu0 %vm986_vm8, %v979_v11 }
 0x1b4   : > { %4029 = vmatmul.mubr.msk.f32.gmra.mrb[30].mxu0 %vm986_vm8, %v980_v54 }
 0x24b   : > { %v3985_v55 = vpop.f32.mrb[0].mxu0 }
 0x24c   : > { %v1822_v58 = vadd.f32 %v3985_v55, %v5424_v39  ;;  %v1624_v4 = vpop.f32.mrb[1].mxu0 }
 0x24d   : > { %v1821_v40 = vadd.f32 %v5424_v39, %v1624_v4 }
 0x24e   : > { %v1854_v29 = vmax.f32 %v1822_v58, 0.0 }
 0x24f   : > { %v1853_v53 = vmax.f32 %v1821_v40, 0.0  ;;  %v3988_v60 = vpop.f32.mrb[2].mxu0 }
 0x250   : > { %1887 = vst.msk [vmem:[#allocation3 + $0x21] sm:$0xff] %vm281_vm2, %v1854_v29  ;;  %v1824_v63 = vadd.f32 %v3988_v60, %v5424_v39  ;;  %v1634_v15 = vpop.f32.mrb[3].mxu0 }
 0x251   : > { %1886 = vst.msk [vmem:[#allocation3 + $0x19] sm:$0xff] %vm281_vm2, %v1853_v53  ;;  %v1823_v13 = vadd.f32 %v5424_v39, %v1634_v15 }
 0x252   : > { %v1856_v16 = vmax.f32 %v1824_v63, 0.0 }
 0x253   : > { %v1855_v33 = vmax.f32 %v1823_v13, 0.0  ;;  %v3991_v24 = vpop.f32.mrb[4].mxu0 }
 0x254   : > { %1889 = vst.msk [vmem:[#allocation3 + $0x39] sm:$0xff] %vm281_vm2, %v1856_v16  ;;  %v1826_v41 = vadd.f32 %v3991_v24, %v5424_v39  ;;  %v1644_v45 = vpop.f32.mrb[5].mxu0 }
 0x255   : > { %1888 = vst.msk [vmem:[#allocation3 + $0x31] sm:$0xff] %vm281_vm2, %v1855_v33  ;;  %v1825_v25 = vadd.f32 %v5424_v39, %v1644_v45 }
 0x256   : > { %v1858_v26 = vmax.f32 %v1826_v41, 0.0 }
 0x257   : > { %v1857_v34 = vmax.f32 %v1825_v25, 0.0  ;;  %v3994_v50 = vpop.f32.mrb[6].mxu0  ;;  %v1923_v42 = vld [vmem:[#allocation3 + $0x28] sm:$0x3] }
 0x258   : > { %1891 = vst.msk [vmem:[#allocation3 + $0x51] sm:$0xff] %vm281_vm2, %v1858_v26  ;;  %v1828_v47 = vadd.f32 %v3994_v50, %v5424_v39  ;;  %v1654_v62 = vpop.f32.mrb[7].mxu0  ;;  %v5447_v2 = vld [vmem:[#allocation3 + $0x20] sm:$0xff]  ;;  %v2035_v49 = vrot.slane %v1923_v42, 1  ;;  %v5449_v44 = vld [vmem:[#allocation3 + $0x18] sm:$0xff]  ;;  %v2233_v23 = vrot.slane %v1923_v42, 2 }
 0x259   : > { %1890 = vst.msk [vmem:[#allocation3 + $0x49] sm:$0xff] %vm281_vm2, %v1857_v34  ;;  %v1827_v52 = vadd.f32 %v5424_v39, %v1654_v62  ;;  %v2033_v38 = vrot.slane %v5447_v2, 1  ;;  %v2032_v57 = vrot.slane %v5449_v44, 1  ;;  %v2231_v19 = vrot.slane %v5447_v2, 2 }
 0x25a   : > { %v1860_v1 = vmax.f32 %v1828_v47, 0.0  ;;  %v2230_v3 = vrot.slane %v5449_v44, 2 }
 0x25b   : > { %v1859_v59 = vmax.f32 %v1827_v52, 0.0  ;;  %v3997_v61 = vpop.f32.mrb[8].mxu0  ;;  %v2036_v10 = vsel %vm511_vm5, %v2033_v38, %v2035_v49  ;;  %v2034_v7 = vsel %vm511_vm5, %v2032_v57, %v2033_v38  ;;  %v1926_v20 = vld [vmem:[#allocation3 + $0x40] sm:$0x3]  ;;  %v2234_v0 = vsel %vm710_vm4, %v2231_v19, %v2233_v23 }
 0x25c   : > { %1893 = vst.msk [vmem:[#allocation3 + $0x69] sm:$0xff] %vm281_vm2, %v1860_v1  ;;  %v1830_v18 = vadd.f32 %v3997_v61, %v5424_v39  ;;  %2123 = vrot.lane.b32.xlu1 %v2036_v10, %s4376_s29  ;;  %2121 = vrot.lane.b32.xlu0 %v2034_v7, %s4376_s29  ;;  %v1664_v48 = vpop.f32.mrb[9].mxu0  ;;  %v5463_v51 = vld [vmem:[#allocation3 + $0x38] sm:$0xff]  ;;  %v5465_v9 = vld [vmem:[#allocation3 + $0x30] sm:$0xff]  ;;  %v2232_v36 = vsel %vm710_vm4, %v2230_v3, %v2231_v19  ;;  %v2040_v11 = vrot.slane %v1926_v20, 1  ;;  %v2238_v37 = vrot.slane %v1926_v20, 2 }
 0x25d   : > { %1892 = vst.msk [vmem:[#allocation3 + $0x61] sm:$0xff] %vm281_vm2, %v1859_v59  ;;  %v1829_v28 = vadd.f32 %v5424_v39, %v1664_v48  ;;  %v2038_v43 = vrot.slane %v5463_v51, 1  ;;  %v2037_v12 = vrot.slane %v5465_v9, 1  ;;  %v2236_v31 = vrot.slane %v5463_v51, 2 }
 0x25e   : > { %v1862_v21 = vmax.f32 %v1830_v18, 0.0  ;;  %v2235_v55 = vrot.slane %v5465_v9, 2 }
 0x25f   : > { %v1861_v5 = vmax.f32 %v1829_v28, 0.0  ;;  %v4000_v30 = vpop.f32.mrb[10].mxu0  ;;  %v2041_v40 = vsel %vm511_vm5, %v2038_v43, %v2040_v11  ;;  %v2039_v17 = vsel %vm511_vm5, %v2037_v12, %v2038_v43  ;;  %v1929_v53 = vld [vmem:[#allocation3 + $0x58] sm:$0x3]  ;;  %v2239_v13 = vsel %vm710_vm4, %v2236_v31, %v2238_v37 }
 0x260   : > { %1895 = vst.msk [vmem:[#allocation3 + $0x81] sm:$0xff] %vm281_vm2, %v1862_v21  ;;  %v1832_v54 = vadd.f32 %v4000_v30, %v5424_v39  ;;  %2321 = vrot.lane.b32.xlu1 %v2234_v0, %s4378_s25  ;;  %2319 = vrot.lane.b32.xlu0 %v2232_v36, %s4378_s25  ;;  %v1674_v8 = vpop.f32.mrb[11].mxu0  ;;  %v5487_v46 = vld [vmem:[#allocation3 + $0x50] sm:$0xff]  ;;  %v5489_v60 = vld [vmem:[#allocation3 + $0x48] sm:$0xff]  ;;  %v2237_v16 = vsel %vm710_vm4, %v2235_v55, %v2236_v31  ;;  %v2045_v41 = vrot.slane %v1929_v53, 1  ;;  %v2243_v47 = vrot.slane %v1929_v53, 2 }
 0x261   : > { %1894 = vst.msk [vmem:[#allocation3 + $0x79] sm:$0xff] %vm281_vm2, %v1861_v5  ;;  %v1831_v35 = vadd.f32 %v5424_v39, %v1674_v8  ;;  %v2043_v22 = vrot.slane %v5487_v46, 1  ;;  %v2042_v45 = vrot.slane %v5489_v60, 1  ;;  %v2241_v42 = vrot.slane %v5487_v46, 2 }
 0x262   : > { %v1864_v27 = vmax.f32 %v1832_v54, 0.0  ;;  %v2240_v62 = vrot.slane %v5489_v60, 2 }
 0x263   : > { %v1863_v58 = vmax.f32 %v1831_v35, 0.0  ;;  %v4003_v4 = vpop.f32.mrb[12].mxu0  ;;  %v2046_v38 = vsel %vm511_vm5, %v2043_v22, %v2045_v41  ;;  %v2044_v57 = vsel %vm511_vm5, %v2042_v45, %v2043_v22  ;;  %v1932_v3 = vld [vmem:[#allocation3 + $0x70] sm:$0x3]  ;;  %v2244_v7 = vsel %vm710_vm4, %v2241_v42, %v2243_v47 }
 0x264   : > { %1897 = vst.msk [vmem:[#allocation3 + $0x99] sm:$0xff] %vm281_vm2, %v1864_v27  ;;  %v1834_v32 = vadd.f32 %v4003_v4, %v5424_v39  ;;  %2127 = vrot.lane.b32.xlu1 %v2041_v40, %s4376_s29  ;;  %2125 = vrot.lane.b32.xlu0 %v2039_v17, %s4376_s29  ;;  %v1684_v29 = vpop.f32.mrb[13].mxu0  ;;  %v5511_v23 = vld [vmem:[#allocation3 + $0x68] sm:$0xff]  ;;  %v5513_v59 = vld [vmem:[#allocation3 + $0x60] sm:$0xff]  ;;  %v2242_v18 = vsel %vm710_vm4, %v2240_v62, %v2241_v42  ;;  %v2050_v21 = vrot.slane %v1932_v3, 1  ;;  %v2248_v12 = vrot.slane %v1932_v3, 2 }
 0x265   : > { %1896 = vst.msk [vmem:[#allocation3 + $0x91] sm:$0xff] %vm281_vm2, %v1863_v58  ;;  %v1833_v63 = vadd.f32 %v5424_v39, %v1684_v29  ;;  %v2048_v28 = vrot.slane %v5511_v23, 1  ;;  %v2047_v0 = vrot.slane %v5513_v59, 1  ;;  %v2246_v11 = vrot.slane %v5511_v23, 2 }
 0x266   : > { %v1866_v15 = vmax.f32 %v1834_v32, 0.0  ;;  %v2245_v54 = vrot.slane %v5513_v59, 2 }
 0x267   : > { %v1865_v33 = vmax.f32 %v1833_v63, 0.0  ;;  %v4006_v24 = vpop.f32.mrb[14].mxu0  ;;  %v2051_v27 = vsel %vm511_vm5, %v2048_v28, %v2050_v21  ;;  %v2049_v31 = vsel %vm511_vm5, %v2047_v0, %v2048_v28  ;;  %v1935_v4 = vld [vmem:[#allocation3 + $0x88] sm:$0x3]  ;;  %v2249_v29 = vsel %vm710_vm4, %v2246_v11, %v2248_v12 }
 0x268   : > { %1899 = vst.msk [vmem:[#allocation3 + $0xb1] sm:$0xff] %vm281_vm2, %v1866_v15  ;;  %v1836_v25 = vadd.f32 %v4006_v24, %v5424_v39  ;;  %2325 = vrot.lane.b32.xlu1 %v2239_v13, %s4378_s25  ;;  %2323 = vrot.lane.b32.xlu0 %v2237_v16, %s4378_s25  ;;  %v1694_v26 = vpop.f32.mrb[15].mxu0  ;;  %v5535_v58 = vld [vmem:[#allocation3 + $0x80] sm:$0xff]  ;;  %v5537_v40 = vld [vmem:[#allocation3 + $0x78] sm:$0xff]  ;;  %v2247_v53 = vsel %vm710_vm4, %v2245_v54, %v2246_v11  ;;  %v2055_v16 = vrot.slane %v1935_v4, 1 }
 0x269   : > { %1898 = vst.msk [vmem:[#allocation3 + $0xa9] sm:$0xff] %vm281_vm2, %v1865_v33  ;;  %v1835_v34 = vadd.f32 %v5424_v39, %v1694_v26  ;;  %v2053_v13 = vrot.slane %v5535_v58, 1  ;;  %v2052_v33 = vrot.slane %v5537_v40, 1  ;;  %v2253_v26 = vrot.slane %v1935_v4, 2 }
 0x26a   : > { %v1868_v50 = vmax.f32 %v1836_v25, 0.0  ;;  %v2251_v25 = vrot.slane %v5535_v58, 2 }
 0x26b   : > { %v1867_v49 = vmax.f32 %v1835_v34, 0.0  ;;  %v4009_v52 = vpop.f32.mrb[16].mxu0  ;;  %v2250_v34 = vrot.slane %v5537_v40, 2  ;;  %v2056_v47 = vsel %vm511_vm5, %v2053_v13, %v2055_v16  ;;  %v2054_v62 = vsel %vm511_vm5, %v2052_v33, %v2053_v13 }
 0x26c   : > { %1901 = vst.msk [vmem:[#allocation3 + $0xc9] sm:$0xff] %vm281_vm2, %v1868_v50  ;;  %v1838_v1 = vadd.f32 %v4009_v52, %v5424_v39  ;;  %2131 = vrot.lane.b32.xlu1 %v2046_v38, %s4376_s29  ;;  %2129 = vrot.lane.b32.xlu0 %v2044_v57, %s4376_s29  ;;  %v1704_v19 = vpop.f32.mrb[17].mxu0  ;;  %v5559_v38 = vld [vmem:[#allocation3 + $0x98] sm:$0xff]  ;;  %v1938_v57 = vld [vmem:[#allocation3 + $0xa0] sm:$0x3] }
 0x26d   : > { %1900 = vst.msk [vmem:[#allocation3 + $0xc1] sm:$0xff] %vm281_vm2, %v1867_v49  ;;  %v1837_v61 = vadd.f32 %v5424_v39, %v1704_v19 }
 0x26e   : > { %v1870_v10 = vmax.f32 %v1838_v1, 0.0  ;;  %v5561_v1 = vld [vmem:[#allocation3 + $0x90] sm:$0xff] }
 0x26f   : > { %v1869_v48 = vmax.f32 %v1837_v61, 0.0  ;;  %v4012_v20 = vpop.f32.mrb[18].mxu0  ;;  %v2254_v61 = vsel %vm710_vm4, %v2251_v25, %v2253_v26  ;;  %v2057_v28 = vrot.slane %v5561_v1, 1  ;;  %v2255_v11 = vrot.slane %v5561_v1, 2 }
 0x270   : > { %1903 = vst.msk [vmem:[#allocation3 + $0xe1] sm:$0xff] %vm281_vm2, %v1870_v10  ;;  %v1840_v36 = vadd.f32 %v4012_v20, %v5424_v39  ;;  %2329 = vrot.lane.b32.xlu1 %v2244_v7, %s4378_s25  ;;  %2327 = vrot.lane.b32.xlu0 %v2242_v18, %s4378_s25  ;;  %v1714_v5 = vpop.f32.mrb[19].mxu0  ;;  %v2252_v10 = vsel %vm710_vm4, %v2250_v34, %v2251_v25  ;;  %v2060_v20 = vrot.slane %v1938_v57, 1  ;;  %v5585_v4 = vld [vmem:[#allocation3 + $0xa8] sm:$0xff] }
 0x271   : > { %1902 = vst.msk [vmem:[#allocation3 + $0xd9] sm:$0xff] %vm281_vm2, %v1869_v48  ;;  %v1839_v30 = vadd.f32 %v5424_v39, %v1714_v5  ;;  %v2058_v48 = vrot.slane %v5559_v38, 1  ;;  %v2062_v33 = vrot.slane %v5585_v4, 1 }
 0x272   : > { %v1872_v43 = vmax.f32 %v1840_v36, 0.0 }
 0x273   : > { %v1871_v8 = vmax.f32 %v1839_v30, 0.0  ;;  %v4015_v35 = vpop.f32.mrb[20].mxu0  ;;  %v2256_v30 = vrot.slane %v5559_v38, 2 }
 0x274   : > { %1905 = vst.msk [vmem:[#allocation3 + $0xf9] sm:$0xff] %vm281_vm2, %v1872_v43  ;;  %v1842_v37 = vadd.f32 %v4015_v35, %v5424_v39  ;;  %2135 = vrot.lane.b32.xlu1 %v2051_v27, %s4376_s29  ;;  %2133 = vrot.lane.b32.xlu0 %v2049_v31, %s4376_s29  ;;  %v1724_v55 = vpop.f32.mrb[21].mxu0  ;;  %v2258_v43 = vrot.slane %v1938_v57, 2  ;;  %v2059_v35 = vsel %vm511_vm5, %v2057_v28, %v2058_v48 }
 0x275   : > { %1904 = vst.msk [vmem:[#allocation3 + $0xf1] sm:$0xff] %vm281_vm2, %v1871_v8  ;;  %v1841_v17 = vadd.f32 %v5424_v39, %v1724_v55  ;;  %v2061_v8 = vsel %vm511_vm5, %v2058_v48, %v2060_v20  ;;  %v1941_v55 = vld [vmem:[#allocation3 + $0xb8] sm:$0x3] }
 0x276   : > { %v1874_v32 = vmax.f32 %v1842_v37, 0.0  ;;  %v5583_v37 = vld [vmem:[#allocation3 + $0xb0] sm:$0xff]  ;;  %v2065_v16 = vrot.slane %v1941_v55, 1  ;;  %v2263_v26 = vrot.slane %v1941_v55, 2 }
 0x277   : > { %v1873_v63 = vmax.f32 %v1841_v17, 0.0  ;;  %v4018_v15 = vpop.f32.mrb[22].mxu0  ;;  %v2063_v13 = vrot.slane %v5583_v37, 1  ;;  %v2261_v25 = vrot.slane %v5583_v37, 2 }
 0x278   : > { %1907 = vst.msk [vmem:[#allocation3 + $0x111] sm:$0xff] %vm281_vm2, %v1874_v32  ;;  %v1844_v24 = vadd.f32 %v4018_v15, %v5424_v39  ;;  %2333 = vrot.lane.b32.xlu1 %v2249_v29, %s4378_s25  ;;  %2331 = vrot.lane.b32.xlu0 %v2247_v53, %s4378_s25  ;;  %v1734_v22 = vpop.f32.mrb[23].mxu0  ;;  %v2259_v29 = vsel %vm710_vm4, %v2256_v30, %v2258_v43 }
 0x279   : > { %1906 = vst.msk [vmem:[#allocation3 + $0x109] sm:$0xff] %vm281_vm2, %v1873_v63  ;;  %v1843_v41 = vadd.f32 %v5424_v39, %v1734_v22  ;;  %v2257_v53 = vsel %vm710_vm4, %v2255_v11, %v2256_v30  ;;  %v5634_v30 = vld [vmem:[#allocation3 + $0xd8] sm:$0xff] }
 0x27a   : > { %v1876_v45 = vmax.f32 %v1844_v24, 0.0 }
 0x27b   : > { %v1875_v50 = vmax.f32 %v1843_v41, 0.0  ;;  %v4021_v42 = vpop.f32.mrb[24].mxu0 }
 0x27c   : > { %1909 = vst.msk [vmem:[#allocation3 + $0x129] sm:$0xff] %vm281_vm2, %v1876_v45  ;;  %v1846_v49 = vadd.f32 %v4021_v42, %v5424_v39  ;;  %2139 = vrot.lane.b32.xlu1 %v2056_v47, %s4376_s29  ;;  %2137 = vrot.lane.b32.xlu0 %v2054_v62, %s4376_s29  ;;  %v1744_v52 = vpop.f32.mrb[25].mxu0  ;;  %v2064_v42 = vsel %vm511_vm5, %v2062_v33, %v2063_v13  ;;  %v2260_v47 = vrot.slane %v5585_v4, 2  ;;  %v5606_v62 = vld [vmem:[#allocation3 + $0xc8] sm:$0xff] }
 0x27d   : > { %1908 = vst.msk [vmem:[#allocation3 + $0x121] sm:$0xff] %vm281_vm2, %v1875_v50  ;;  %v1845_v19 = vadd.f32 %v5424_v39, %v1744_v52  ;;  %v2066_v50 = vsel %vm511_vm5, %v2063_v13, %v2065_v16  ;;  %v2264_v52 = vsel %vm710_vm4, %v2261_v25, %v2263_v26  ;;  %v2266_v48 = vrot.slane %v5606_v62, 2 }
 0x27e   : > { %v1878_v3 = vmax.f32 %v1846_v49, 0.0  ;;  %v5608_v49 = vld [vmem:[#allocation3 + $0xc0] sm:$0xff]  ;;  %v2262_v57 = vsel %vm710_vm4, %v2260_v47, %v2261_v25 }
 0x27f   : > { %v1877_v7 = vmax.f32 %v1845_v19, 0.0  ;;  %v4024_v18 = vpop.f32.mrb[26].mxu0  ;;  %v2068_v19 = vrot.slane %v5606_v62, 1 }
 0x280   : > { %1911 = vst.msk [vmem:[#allocation3 + $0x141] sm:$0xff] %vm281_vm2, %v1878_v3  ;;  %v1848_v21 = vadd.f32 %v4024_v18, %v5424_v39  ;;  %2337 = vrot.lane.b32.xlu1 %v2254_v61, %s4378_s25  ;;  %2335 = vrot.lane.b32.xlu0 %v2252_v10, %s4378_s25  ;;  %v1754_v0 = vpop.f32.mrb[27].mxu0  ;;  %v2067_v61 = vrot.slane %v5608_v49, 1  ;;  %v2496_v10 = vld [vmem:[%s6282_s3] sm:$0xff] }
 0x281   : > { %1910 = vst.msk [vmem:[#allocation3 + $0x139] sm:$0xff] %vm281_vm2, %v1877_v7  ;;  %v1847_v36 = vadd.f32 %v5424_v39, %v1754_v0  ;;  %v2497_v7 = vld [vmem:[%s6282_s3 + $0x8] sm:$0xff]  ;;  %v2265_v0 = vrot.slane %v5608_v49, 2  ;;  %v5664_v26 = vld [vmem:[#allocation3 + $0x110] sm:$0xff] }
 0x282   : > { %v1880_v5 = vmax.f32 %v1848_v21, 0.0  ;;  %v5623_v18 = vpack.c.bf16 %v2497_v7, %v2496_v10  ;;  %v2069_v21 = vsel %vm511_vm5, %v2067_v61, %v2068_v19 }
 0x283   : > { %v1879_v12 = vmax.f32 %v1847_v36, 0.0  ;;  %v4027_v54 = vpop.f32.mrb[28].mxu0  ;;  %v5632_v36 = vld [vmem:[#allocation3 + $0xe0] sm:$0xff]  ;;  %v2267_v11 = vsel %vm710_vm4, %v2265_v0, %v2266_v48 }
 0x284   : > { %1913 = vst.msk [vmem:[#allocation3 + $0x159] sm:$0xff] %vm281_vm2, %v1880_v5  ;;  %v1850_v27 = vadd.f32 %v4027_v54, %v5424_v39  ;;  %2143 = vrot.lane.b32.xlu1 %v2061_v8, %s4376_s29  ;;  %2141 = vrot.lane.b32.xlu0 %v2059_v35, %s4376_s29  ;;  %v1764_v31 = vpop.f32.mrb[29].mxu0  ;;  %v1947_v5 = vld [vmem:[#allocation3 + $0xe8] sm:$0x3]  ;;  %v2072_v8 = vrot.slane %v5634_v30, 1  ;;  %v2271_v35 = vrot.slane %v5632_v36, 2 }
 0x285   : > { %1912 = vst.msk [vmem:[#allocation3 + $0x151] sm:$0xff] %vm281_vm2, %v1879_v12  ;;  %v1849_v17 = vadd.f32 %v5424_v39, %v1764_v31  ;;  %4216 = vmatprep.subr.bf16.mxu1 %v5623_v18  ;;  %v2073_v12 = vrot.slane %v5632_v36, 1  ;;  %v2075_v54 = vrot.slane %v1947_v5, 1 }
 0x286   : > { %v1882_v32 = vmax.f32 %v1850_v27, 0.0  ;;  %v2273_v27 = vrot.slane %v1947_v5, 2 }
 0x287   : > { %v1881_v63 = vmax.f32 %v1849_v17, 0.0  ;;  %v4030_v15 = vpop.f32.mrb[30].mxu0  ;;  %v2076_v31 = vsel %vm511_vm5, %v2073_v12, %v2075_v54  ;;  %v2074_v55 = vsel %vm511_vm5, %v2072_v8, %v2073_v12  ;;  %v2270_v17 = vrot.slane %v5634_v30, 2 }
 0x288   : > { %1915 = vst.msk [vmem:[#allocation3 + $0x171] sm:$0xff] %vm281_vm2, %v1882_v32  ;;  %v1852_v24 = vadd.f32 %v4030_v15, %v5424_v39  ;;  %2341 = vrot.lane.b32.xlu1 %v2259_v29, %s4378_s25  ;;  %2339 = vrot.lane.b32.xlu0 %v2257_v53, %s4378_s25  ;;  %v1774_v22 = vpop.f32.mrb[31].mxu0  ;;  %v5648_v32 = vld [vmem:[#allocation3 + $0xf8] sm:$0xff]  ;;  %v1950_v29 = vld [vmem:[#allocation3 + $0x100] sm:$0x3]  ;;  %v5650_v53 = vld [vmem:[#allocation3 + $0xf0] sm:$0xff] }
 0x289   : > { %1914 = vst.msk [vmem:[#allocation3 + $0x169] sm:$0xff] %vm281_vm2, %v1881_v63  ;;  %v1851_v41 = vadd.f32 %v5424_v39, %v1774_v22  ;;  %v1944_v39 = vld [vmem:[#allocation3 + $0xd0] sm:$0x3]  ;;  %v2274_v63 = vsel %vm710_vm4, %v2271_v35, %v2273_v27  ;;  %v2272_v15 = vsel %vm710_vm4, %v2270_v17, %v2271_v35  ;;  %v2078_v13 = vrot.slane %v5648_v32, 1  ;;  %v5698_v17 = vld [vmem:[#allocation3 + $0x138] sm:$0xff] }
 0x28a   : > { %v1884_v45 = vmax.f32 %v1852_v24, 0.0  ;;  %v2070_v3 = vrot.slane %v1944_v39, 1  ;;  %v2268_v20 = vrot.slane %v1944_v39, 2  ;;  %v2080_v16 = vrot.slane %v1950_v29, 1 }
 0x28b   : > { %v1883_v34 = vmax.f32 %v1851_v41, 0.0  ;;  %v2077_v33 = vrot.slane %v5650_v53, 1  ;;  %v2276_v24 = vrot.slane %v5648_v32, 2  ;;  %v2278_v22 = vrot.slane %v1950_v29, 2 }
 0x28c   : > { %1917 = vst.msk [vmem:[#allocation3 + $0x189] sm:$0xff] %vm281_vm2, %v1884_v45  ;;  %2147 = vrot.lane.b32.xlu1 %v2066_v50, %s4376_s29  ;;  %2145 = vrot.lane.b32.xlu0 %v2064_v42, %s4376_s29  ;;  %v2071_v28 = vsel %vm511_vm5, %v2068_v19, %v2070_v3  ;;  %v2269_v43 = vsel %vm710_vm4, %v2266_v48, %v2268_v20  ;;  %v2275_v25 = vrot.slane %v5650_v53, 2  ;;  %v5666_v50 = vld [vmem:[#allocation3 + $0x108] sm:$0xff]  ;;  %v2083_v39 = vrot.slane %v5664_v26, 1  ;;  %v1956_v20 = vld [vmem:[#allocation3 + $0x130] sm:$0x3] }
 0x28d   : > { %1916 = vst.msk [vmem:[#allocation3 + $0x181] sm:$0xff] %vm281_vm2, %v1883_v34  ;;  %v2081_v41 = vsel %vm511_vm5, %v2078_v13, %v2080_v16  ;;  %v2079_v45 = vsel %vm511_vm5, %v2077_v33, %v2078_v13  ;;  %v1953_v34 = vld [vmem:[#allocation3 + $0x118] sm:$0x3]  ;;  %v2279_v42 = vsel %vm710_vm4, %v2276_v24, %v2278_v22  ;;  %v2281_v19 = vrot.slane %v5664_v26, 2  ;;  %v5680_v48 = vld [vmem:[#allocation3 + $0x128] sm:$0xff] }
 0x28e   : > { %v2277_v47 = vsel %vm710_vm4, %v2275_v25, %v2276_v24  ;;  %v2283_v3 = vrot.slane %v1953_v34, 2  ;;  %v2280_v7 = vrot.slane %v5666_v50, 2  ;;  %v2088_v5 = vrot.slane %v5680_v48, 1  ;;  %v5712_v25 = vld [vmem:[#allocation3 + $0x158] sm:$0xff] }
 0x28f   : > { %v2286_v12 = vrot.slane %v5680_v48, 2  ;;  %v2288_v54 = vrot.slane %v1956_v20, 2  ;;  %v2092_v16 = vrot.slane %v5698_v17, 1 }
 0x290   : > { %2345 = vrot.lane.b32.xlu1 %v2264_v52, %s4378_s25  ;;  %2343 = vrot.lane.b32.xlu0 %v2262_v57, %s4378_s25  ;;  %v2085_v52 = vrot.slane %v1953_v34, 1  ;;  %v2082_v57 = vrot.slane %v5666_v50, 1  ;;  %v2282_v0 = vsel %vm710_vm4, %v2280_v7, %v2281_v19  ;;  %v1962_v34 = vld [vmem:[#allocation3 + $0x160] sm:$0x3] }
 0x291   : > { %v2289_v29 = vsel %vm710_vm4, %v2286_v12, %v2288_v54 }
 0x292   : > { %v2086_v61 = vsel %vm511_vm5, %v2083_v39, %v2085_v52  ;;  %v2084_v10 = vsel %vm511_vm5, %v2082_v57, %v2083_v39  ;;  %v2098_v52 = vrot.slane %v5712_v25, 1  ;;  %v2100_v57 = vrot.slane %v1962_v34, 1 }
 0x294   : > { %2151 = vrot.lane.b32.xlu1 %v2071_v28, %s4376_s29  ;;  %2149 = vrot.lane.b32.xlu0 %v2069_v21, %s4376_s29  ;;  %v5682_v28 = vld [vmem:[#allocation3 + $0x120] sm:$0xff]  ;;  %v2284_v21 = vsel %vm710_vm4, %v2281_v19, %v2283_v3  ;;  %v2296_v3 = vrot.slane %v5712_v25, 2 }
 0x295   : > { %v2285_v27 = vrot.slane %v5682_v28, 2 }
 0x298   : > { %2349 = vrot.lane.b32.xlu1 %v2269_v43, %s4378_s25  ;;  %2347 = vrot.lane.b32.xlu0 %v2267_v11, %s4378_s25  ;;  %v2090_v43 = vrot.slane %v1956_v20, 1  ;;  %v2087_v11 = vrot.slane %v5682_v28, 1 }
 0x29a   : > { %v2091_v8 = vsel %vm511_vm5, %v2088_v5, %v2090_v43  ;;  %v2089_v35 = vsel %vm511_vm5, %v2087_v11, %v2088_v5  ;;  %v5730_v5 = vld [vmem:[#allocation3 + $0x168] sm:$0xff] }
 0x29c   : > { %2155 = vrot.lane.b32.xlu1 %v2076_v31, %s4376_s29  ;;  %2153 = vrot.lane.b32.xlu0 %v2074_v55, %s4376_s29  ;;  %v5696_v31 = vld [vmem:[#allocation3 + $0x140] sm:$0xff]  ;;  %v1959_v55 = vld [vmem:[#allocation3 + $0x148] sm:$0x3] }
 0x29d   : > { %v2095_v13 = vrot.slane %v1959_v55, 1  ;;  %v2291_v33 = vrot.slane %v5696_v31, 2  ;;  %v2293_v24 = vrot.slane %v1959_v55, 2 }
 0x2a0   : > { %2353 = vrot.lane.b32.xlu1 %v2274_v63, %s4378_s25  ;;  %2351 = vrot.lane.b32.xlu0 %v2272_v15, %s4378_s25  ;;  %v2287_v63 = vsel %vm710_vm4, %v2285_v27, %v2286_v12  ;;  %v2093_v15 = vrot.slane %v5696_v31, 1  ;;  %v5740_v27 = vpop.permute.xlu0 %2117 }
 0x2a2   : > { %v2096_v22 = vsel %vm511_vm5, %v2093_v15, %v2095_v13  ;;  %v2300_v13 = vrot.slane %v5730_v5, 2 }
 0x2a4   : > { %2159 = vrot.lane.b32.xlu1 %v2081_v41, %s4376_s29  ;;  %2157 = vrot.lane.b32.xlu0 %v2079_v45, %s4376_s29  ;;  %v2094_v41 = vsel %vm511_vm5, %v2092_v16, %v2093_v15  ;;  %v2290_v45 = vrot.slane %v5698_v17, 2  ;;  %v5748_v16 = vld [vmem:[#allocation3 + $0x188] sm:$0xff] }
 0x2a6   : > { %v2292_v39 = vsel %vm710_vm4, %v2290_v45, %v2291_v33 }
 0x2a8   : > { %2357 = vrot.lane.b32.xlu1 %v2279_v42, %s4378_s25  ;;  %2355 = vrot.lane.b32.xlu0 %v2277_v47, %s4378_s25  ;;  %v5714_v42 = vld [vmem:[#allocation3 + $0x150] sm:$0xff]  ;;  %v2294_v47 = vsel %vm710_vm4, %v2291_v33, %v2293_v24  ;;  %v5750_v24 = vld [vmem:[#allocation3 + $0x180] sm:$0xff] }
 0x2a9   : > { %v2097_v19 = vrot.slane %v5714_v42, 1  ;;  %v2295_v20 = vrot.slane %v5714_v42, 2  ;;  %v1968_v33 = vld [vmem:[#allocation3 + $0x190] sm:$0x3] }
 0x2ab   : > { %v2099_v7 = vsel %vm511_vm5, %v2097_v19, %v2098_v52  ;;  %v2297_v11 = vsel %vm710_vm4, %v2295_v20, %v2296_v3  ;;  %v2305_v20 = vrot.slane %v5750_v24, 2 }
 0x2ac   : > { %2163 = vrot.lane.b32.xlu1 %v2086_v61, %s4376_s29  ;;  %2161 = vrot.lane.b32.xlu0 %v2084_v10, %s4376_s29  ;;  %v2298_v61 = vrot.slane %v1962_v34, 2  ;;  %v2101_v10 = vsel %vm511_vm5, %v2098_v52, %v2100_v57  ;;  %v2107_v52 = vrot.slane %v5750_v24, 1  ;;  %v2308_v57 = vrot.slane %v1968_v33, 2 }
 0x2ae   : > { %v2299_v43 = vsel %vm710_vm4, %v2296_v3, %v2298_v61 }
 0x2b0   : > { %2361 = vrot.lane.b32.xlu1 %v2284_v21, %s4378_s25  ;;  %2359 = vrot.lane.b32.xlu0 %v2282_v0, %s4378_s25  ;;  %v5728_v21 = vld [vmem:[#allocation3 + $0x170] sm:$0xff]  ;;  %v1965_v0 = vld [vmem:[#allocation3 + $0x178] sm:$0x3] }
 0x2b1   : > { %v2103_v12 = vrot.slane %v5728_v21, 1  ;;  %v2105_v54 = vrot.slane %v1965_v0, 1  ;;  %v2301_v55 = vrot.slane %v5728_v21, 2 }
 0x2b3   : > { %v2302_v34 = vsel %vm710_vm4, %v2300_v13, %v2301_v55 }
 0x2b4   : > { %2167 = vrot.lane.b32.xlu1 %v2091_v8, %s4376_s29  ;;  %2165 = vrot.lane.b32.xlu0 %v2089_v35, %s4376_s29  ;;  %v2102_v8 = vrot.slane %v5730_v5, 1  ;;  %v5738_v35 = vpop.permute.xlu1 %2119 }
 0x2b6   : > { %v2104_v15 = vsel %vm511_vm5, %v2102_v8, %v2103_v12  ;;  %v2498_v8 = vld [vmem:[%s6282_s3 + $0x10] sm:$0xff] }
 0x2b8   : > { %2365 = vrot.lane.b32.xlu1 %v2289_v29, %s4378_s25  ;;  %2363 = vrot.lane.b32.xlu0 %v2287_v63, %s4378_s25  ;;  %v2303_v29 = vrot.slane %v1965_v0, 2  ;;  %v2106_v63 = vsel %vm511_vm5, %v2103_v12, %v2105_v54  ;;  %v2225_v54 = vrot.slane %v5412_v14, 2  ;;  %v3629_v14 = vld [vmem:[%s6282_s3 + $0x38] sm:$0xff] }
 0x2ba   : > { %v2304_v45 = vsel %vm710_vm4, %v2301_v55, %v2303_v29  ;;  %v5782_v55 = vld [vmem:[#allocation3 + $0x198] sm:$0xff]  ;;  %v5784_v29 = vld [vmem:[#allocation3 + $0x1a0] sm:$0xff] }
 0x2bc   : > { %2171 = vrot.lane.b32.xlu1 %v2096_v22, %s4376_s29  ;;  %2169 = vrot.lane.b32.xlu0 %v2094_v41, %s4376_s29 }
 0x2c0   : > { %2369 = vrot.lane.b32.xlu1 %v2294_v47, %s4378_s25  ;;  %2367 = vrot.lane.b32.xlu0 %v2292_v39, %s4378_s25  ;;  %v2108_v47 = vrot.slane %v5748_v16, 1  ;;  %v2110_v39 = vrot.slane %v1968_v33, 1 }
 0x2c4   : > { %2175 = vrot.lane.b32.xlu1 %v2101_v10, %s4376_s29  ;;  %2173 = vrot.lane.b32.xlu0 %v2099_v7, %s4376_s29  ;;  %v2306_v7 = vrot.slane %v5748_v16, 2 }
 0x2c6   : > { %v2309_v13 = vsel %vm710_vm4, %v2306_v7, %v2308_v57  ;;  %v2307_v33 = vsel %vm710_vm4, %v2305_v20, %v2306_v7  ;;  %v2311_v7 = vrot.slane %v5784_v29, 2 }
 0x2c8   : > { %2373 = vrot.lane.b32.xlu1 %v2299_v43, %s4378_s25  ;;  %2371 = vrot.lane.b32.xlu0 %v2297_v11, %s4378_s25  ;;  %v2111_v43 = vsel %vm511_vm5, %v2108_v47, %v2110_v39  ;;  %v2109_v11 = vsel %vm511_vm5, %v2107_v52, %v2108_v47  ;;  %v2113_v47 = vrot.slane %v5784_v29, 1 }
 0x2cc   : > { %2179 = vrot.lane.b32.xlu1 %v2106_v63, %s4376_s29  ;;  %2177 = vrot.lane.b32.xlu0 %v2104_v15, %s4376_s29  ;;  %v1971_v15 = vld [vmem:[#allocation3 + $0x1a8] sm:$0x3] }
 0x2cd   : > { %v2115_v39 = vrot.slane %v1971_v15, 1 }
 0x2ce   : > { %v2124_v22 = vpop.permute.xlu1 %2123  ;;  %v2122_v41 = vpop.permute.xlu0 %2121 }
 0x2cf   : > { %v2426_v19 = vsel %vm281_vm2, %v5447_v2, %v2124_v22  ;;  %v2425_v3 = vsel %vm281_vm2, %v5449_v44, %v2122_v41  ;;  %v2226_v2 = vrot.slane %v5408_v6, 2  ;;  %v2228_v44 = vrot.slane %v5410_v56, 2  ;;  %v3628_v56 = vld [vmem:[%s6282_s3 + $0x30] sm:$0xff] }
 0x2d0   : > { %2377 = vrot.lane.b32.xlu1 %v2304_v45, %s4378_s25  ;;  %2375 = vrot.lane.b32.xlu0 %v2302_v34, %s4378_s25  ;;  %v5801_v45 = vpack.c.bf16 %v3629_v14, %v3628_v56  ;;  %v2112_v34 = vrot.slane %v5782_v55, 1 }
 0x2d1   : > { %v2229_v22 = vsel %vm710_vm4, %v2226_v2, %v2228_v44  ;;  %v2227_v41 = vsel %vm710_vm4, %v2225_v54, %v2226_v2 }
 0x2d2   : > { %v2322_v61 = vpop.permute.xlu1 %2321  ;;  %v2320_v10 = vpop.permute.xlu0 %2319 }
 0x2d3   : > { %v5765_v0 = vsel %vm2459_vm10, %v2426_v19, %v2322_v61  ;;  %v5770_v12 = vsel %vm2459_vm10, %v2425_v3, %v2320_v10  ;;  %v2310_v10 = vrot.slane %v5782_v55, 2 }
 0x2d4   : > { %2183 = vrot.lane.b32.xlu1 %v2111_v43, %s4376_s29  ;;  %2181 = vrot.lane.b32.xlu0 %v2109_v11, %s4376_s29  ;;  %v2313_v11 = vrot.slane %v1971_v15, 2 }
 0x2d5   : > { %4037 = vmatprep.mubr.msk.f32.mxu1 %vm2503_vm11, %v5770_v12  ;;  %v2312_v2 = vsel %vm710_vm4, %v2310_v10, %v2311_v7 }
 0x2d6   : > { %4038 = vmatmul.mubr.msk.f32.vlgmr.msra.gmra.mrb[0].mxu1 %vm2503_vm11, %v5765_v0  ;;  %v2128_v63 = vpop.permute.xlu1 %2127  ;;  %v2126_v6 = vpop.permute.xlu0 %2125 }
 0x2d7   : > { %4218 = vmatpush3.bf16.msra.mxu1 %v5623_v18  ;;  %v2428_v52 = vsel %vm281_vm2, %v5463_v51, %v2128_v63  ;;  %v2427_v18 = vsel %vm281_vm2, %v5465_v9, %v2126_v6  ;;  %v2114_v51 = vsel %vm511_vm5, %v2112_v34, %v2113_v47  ;;  %v2116_v9 = vsel %vm511_vm5, %v2113_v47, %v2115_v39 }
 0x2d8   : > { %2381 = vrot.lane.b32.xlu1 %v2309_v13, %s4378_s25  ;;  %2379 = vrot.lane.b32.xlu0 %v2307_v33, %s4378_s25  ;;  %v2314_v6 = vsel %vm710_vm4, %v2311_v7, %v2313_v11 }
 0x2d9   : > { %4089 = vmatprep.subr.mxu1 %v2498_v8 }
 0x2da   : > { %v2326_v57 = vpop.permute.xlu1 %2325  ;;  %v2324_v19 = vpop.permute.xlu0 %2323 }
 0x2db   : > { %v5810_v3 = vsel %vm2459_vm10, %v2428_v52, %v2326_v57  ;;  %v5813_v61 = vsel %vm2459_vm10, %v2427_v18, %v2324_v19  ;;  %4090 = vmatpush3.msra.mxu1 %v2498_v8 }
 0x2dc   : > { %2317 = vrot.lane.b32.xlu1 %v2229_v22, %s4378_s25  ;;  %2315 = vrot.lane.b32.xlu0 %v2227_v41, %s4378_s25 }
 0x2dd   : > { %4040 = vmatprep.mubr.msk.f32.mxu1 %vm2503_vm11, %v5813_v61  ;;  %4220 = vmatprep.subr.bf16.mxu1 %v5801_v45 }
 0x2de   : > { %4041 = vmatmul.mubr.msk.f32.gmra.mrb[2].mxu1 %vm2503_vm11, %v5810_v3  ;;  %v2132_v20 = vpop.permute.xlu1 %2131  ;;  %v2130_v43 = vpop.permute.xlu0 %2129 }
 0x2df   : > { %v2430_v44 = vsel %vm281_vm2, %v5487_v46, %v2132_v20  ;;  %v2429_v54 = vsel %vm281_vm2, %v5489_v60, %v2130_v43 }
 0x2e0   : > { %2185 = vrot.lane.b32.xlu0 %v2114_v51, %s4376_s29  ;;  %2187 = vrot.lane.b32.xlu1 %v2116_v9, %s4376_s29 }
 0x2e2   : > { %v2330_v8 = vpop.permute.xlu1 %2329  ;;  %v2328_v63 = vpop.permute.xlu0 %2327 }
 0x2e3   : > { %v5835_v56 = vsel %vm2459_vm10, %v2430_v44, %v2330_v8  ;;  %v5838_v14 = vsel %vm2459_vm10, %v2429_v54, %v2328_v63 }
 0x2e4   : > { %4043 = vmatprep.mubr.msk.f32.mxu1 %vm2503_vm11, %v5838_v14  ;;  %2383 = vrot.lane.b32.xlu0 %v2312_v2, %s4378_s25 }
 0x2e5   : > { %4044 = vmatmul.mubr.msk.f32.gmra.mrb[4].mxu1 %vm2503_vm11, %v5835_v56  ;;  %2385 = vrot.lane.b32.xlu1 %v2314_v6, %s4378_s25 }
 0x2e6   : > { %v2136_v46 = vpop.permute.xlu1 %2135  ;;  %v2134_v60 = vpop.permute.xlu0 %2133 }
 0x2e7   : > { %v2432_v15 = vsel %vm281_vm2, %v5511_v23, %v2136_v46  ;;  %v2431_v13 = vsel %vm281_vm2, %v5513_v59, %v2134_v60 }
 0x2ea   : > { %v2334_v33 = vpop.permute.xlu1 %2333  ;;  %v2332_v22 = vpop.permute.xlu0 %2331 }
 0x2eb   : > { %v5851_v41 = vsel %vm2459_vm10, %v2432_v15, %v2334_v33  ;;  %v5854_v34 = vsel %vm2459_vm10, %v2431_v13, %v2332_v22 }
 0x2ec   : > { %4046 = vmatprep.mubr.msk.f32.mxu1 %vm2503_vm11, %v5854_v34 }
 0x2ed   : > { %4047 = vmatmul.mubr.msk.f32.gmra.mrb[6].mxu1 %vm2503_vm11, %v5851_v41 }
 0x2ee   : > { %v2140_v47 = vpop.permute.xlu1 %2139  ;;  %v2138_v39 = vpop.permute.xlu0 %2137 }
 0x2ef   : > { %v2434_v23 = vsel %vm281_vm2, %v5535_v58, %v2140_v47  ;;  %v2433_v59 = vsel %vm281_vm2, %v5537_v40, %v2138_v39 }
 0x2f2   : > { %v2338_v52 = vpop.permute.xlu1 %2337  ;;  %v2336_v18 = vpop.permute.xlu0 %2335 }
 0x2f3   : > { %v5865_v57 = vsel %vm2459_vm10, %v2434_v23, %v2338_v52  ;;  %v5868_v19 = vsel %vm2459_vm10, %v2433_v59, %v2336_v18 }
 0x2f4   : > { %4049 = vmatprep.mubr.msk.f32.mxu1 %vm2503_vm11, %v5868_v19 }
 0x2f5   : > { %4050 = vmatmul.mubr.msk.f32.gmra.mrb[8].mxu1 %vm2503_vm11, %v5865_v57 }
 0x2f6   : > { %v2144_v51 = vpop.permute.xlu1 %2143  ;;  %v2142_v9 = vpop.permute.xlu0 %2141 }
 0x2f7   : > { %v2436_v58 = vsel %vm281_vm2, %v5559_v38, %v2144_v51  ;;  %v2435_v40 = vsel %vm281_vm2, %v5561_v1, %v2142_v9 }
 0x2fa   : > { %v2342_v10 = vpop.permute.xlu1 %2341  ;;  %v2340_v7 = vpop.permute.xlu0 %2339 }
 0x2fb   : > { %v5879_v20 = vsel %vm2459_vm10, %v2436_v58, %v2342_v10  ;;  %v5882_v43 = vsel %vm2459_vm10, %v2435_v40, %v2340_v7 }
 0x2fc   : > { %4052 = vmatprep.mubr.msk.f32.mxu1 %vm2503_vm11, %v5882_v43 }
 0x2fd   : > { %4053 = vmatmul.mubr.msk.f32.gmra.mrb[10].mxu1 %vm2503_vm11, %v5879_v20 }
 0x2fe   : > { %v2148_v11 = vpop.permute.xlu1 %2147  ;;  %v2146_v2 = vpop.permute.xlu0 %2145 }
 0x2ff   : > { %v2438_v38 = vsel %vm281_vm2, %v5583_v37, %v2148_v11  ;;  %v2437_v1 = vsel %vm281_vm2, %v5585_v4, %v2146_v2 }
 0x302   : > { %v2346_v44 = vpop.permute.xlu1 %2345  ;;  %v2344_v54 = vpop.permute.xlu0 %2343 }
 0x303   : > { %v5893_v8 = vsel %vm2459_vm10, %v2438_v38, %v2346_v44  ;;  %v5896_v63 = vsel %vm2459_vm10, %v2437_v1, %v2344_v54 }
 0x304   : > { %4055 = vmatprep.mubr.msk.f32.mxu1 %vm2503_vm11, %v5896_v63 }
 0x305   : > { %4056 = vmatmul.mubr.msk.f32.gmra.mrb[12].mxu1 %vm2503_vm11, %v5893_v8 }
 0x306   : > { %v2152_v6 = vpop.permute.xlu1 %2151  ;;  %v2150_v46 = vpop.permute.xlu0 %2149 }
 0x307   : > { %v2440_v37 = vsel %vm281_vm2, %v5606_v62, %v2152_v6  ;;  %v2439_v4 = vsel %vm281_vm2, %v5608_v49, %v2150_v46 }
 0x30a   : > { %v2350_v60 = vpop.permute.xlu1 %2349  ;;  %v2348_v15 = vpop.permute.xlu0 %2347 }
 0x30b   : > { %v5907_v13 = vsel %vm2459_vm10, %v2440_v37, %v2350_v60  ;;  %v5910_v33 = vsel %vm2459_vm10, %v2439_v4, %v2348_v15 }
 0x30c   : > { %4058 = vmatprep.mubr.msk.f32.mxu1 %vm2503_vm11, %v5910_v33 }
 0x30d   : > { %4059 = vmatmul.mubr.msk.f32.gmra.mrb[14].mxu1 %vm2503_vm11, %v5907_v13 }
 0x30e   : > { %v2156_v22 = vpop.permute.xlu1 %2155  ;;  %v2154_v47 = vpop.permute.xlu0 %2153 }
 0x30f   : > { %v2442_v62 = vsel %vm281_vm2, %v5632_v36, %v2156_v22  ;;  %v2441_v49 = vsel %vm281_vm2, %v5634_v30, %v2154_v47 }
 0x312   : > { %v2354_v39 = vpop.permute.xlu1 %2353  ;;  %v2352_v23 = vpop.permute.xlu0 %2351 }
 0x313   : > { %v5921_v59 = vsel %vm2459_vm10, %v2442_v62, %v2354_v39  ;;  %v5924_v52 = vsel %vm2459_vm10, %v2441_v49, %v2352_v23 }
 0x314   : > { %4061 = vmatprep.mubr.msk.f32.mxu1 %vm2503_vm11, %v5924_v52 }
 0x315   : > { %4062 = vmatmul.mubr.msk.f32.gmra.mrb[16].mxu1 %vm2503_vm11, %v5921_v59 }
 0x316   : > { %v2160_v18 = vpop.permute.xlu1 %2159  ;;  %v2158_v51 = vpop.permute.xlu0 %2157 }
 0x317   : > { %v2444_v36 = vsel %vm281_vm2, %v5648_v32, %v2160_v18  ;;  %v2443_v30 = vsel %vm281_vm2, %v5650_v53, %v2158_v51 }
 0x31a   : > { %v2358_v9 = vpop.permute.xlu1 %2357  ;;  %v2356_v58 = vpop.permute.xlu0 %2355 }
 0x31b   : > { %v5935_v40 = vsel %vm2459_vm10, %v2444_v36, %v2358_v9  ;;  %v5938_v10 = vsel %vm2459_vm10, %v2443_v30, %v2356_v58 }
 0x31c   : > { %4064 = vmatprep.mubr.msk.f32.mxu1 %vm2503_vm11, %v5938_v10 }
 0x31d   : > { %4065 = vmatmul.mubr.msk.f32.gmra.mrb[18].mxu1 %vm2503_vm11, %v5935_v40 }
 0x31e   : > { %v2164_v7 = vpop.permute.xlu1 %2163  ;;  %v2162_v11 = vpop.permute.xlu0 %2161 }
 0x31f   : > { %v2446_v32 = vsel %vm281_vm2, %v5664_v26, %v2164_v7  ;;  %v2445_v53 = vsel %vm281_vm2, %v5666_v50, %v2162_v11 }
 0x322   : > { %v2362_v2 = vpop.permute.xlu1 %2361  ;;  %v2360_v38 = vpop.permute.xlu0 %2359 }
 0x323   : > { %v5949_v1 = vsel %vm2459_vm10, %v2446_v32, %v2362_v2  ;;  %v5952_v44 = vsel %vm2459_vm10, %v2445_v53, %v2360_v38 }
 0x324   : > { %4067 = vmatprep.mubr.msk.f32.mxu1 %vm2503_vm11, %v5952_v44 }
 0x325   : > { %4068 = vmatmul.mubr.msk.f32.gmra.mrb[20].mxu1 %vm2503_vm11, %v5949_v1 }
 0x326   : > { %v2168_v54 = vpop.permute.xlu1 %2167  ;;  %v2166_v6 = vpop.permute.xlu0 %2165 }
 0x327   : > { %v2448_v26 = vsel %vm281_vm2, %v5680_v48, %v2168_v54  ;;  %v2447_v50 = vsel %vm281_vm2, %v5682_v28, %v2166_v6 }
 0x32a   : > { %v2366_v46 = vpop.permute.xlu1 %2365  ;;  %v2364_v37 = vpop.permute.xlu0 %2363 }
 0x32b   : > { %v5963_v4 = vsel %vm2459_vm10, %v2448_v26, %v2366_v46  ;;  %v5966_v60 = vsel %vm2459_vm10, %v2447_v50, %v2364_v37  ;;  %v4364_v37 = vld [vmem:[#allocation3 + $0x8] sm:$0xff] }
 0x32c   : > { %4070 = vmatprep.mubr.msk.f32.mxu1 %vm2503_vm11, %v5966_v60 }
 0x32d   : > { %4071 = vmatmul.mubr.msk.f32.gmra.mrb[22].mxu1 %vm2503_vm11, %v5963_v4 }
 0x32e   : > { %v2172_v15 = vpop.permute.xlu1 %2171  ;;  %v2170_v22 = vpop.permute.xlu0 %2169 }
 0x32f   : > { %v2450_v48 = vsel %vm281_vm2, %v5696_v31, %v2172_v15  ;;  %v2449_v28 = vsel %vm281_vm2, %v5698_v17, %v2170_v22  ;;  %v4365_v15 = vld [vmem:[#allocation3] sm:$0xff] }
 0x332   : > { %v2370_v47 = vpop.permute.xlu1 %2369  ;;  %v2368_v62 = vpop.permute.xlu0 %2367 }
 0x333   : > { %v5977_v49 = vsel %vm2459_vm10, %v2450_v48, %v2370_v47  ;;  %v5980_v39 = vsel %vm2459_vm10, %v2449_v28, %v2368_v62  ;;  %v3630_v62 = vld [vmem:[%s6282_s3 + $0x40] sm:$0xff] }
 0x334   : > { %4073 = vmatprep.mubr.msk.f32.mxu1 %vm2503_vm11, %v5980_v39 }
 0x335   : > { %4074 = vmatmul.mubr.msk.f32.gmra.mrb[24].mxu1 %vm2503_vm11, %v5977_v49 }
 0x336   : > { %v2176_v23 = vpop.permute.xlu1 %2175  ;;  %v2174_v18 = vpop.permute.xlu0 %2173 }
 0x337   : > { %v2452_v31 = vsel %vm281_vm2, %v5712_v25, %v2176_v23  ;;  %v2451_v17 = vsel %vm281_vm2, %v5714_v42, %v2174_v18 }
 0x33a   : > { %v2374_v51 = vpop.permute.xlu1 %2373  ;;  %v2372_v36 = vpop.permute.xlu0 %2371 }
 0x33b   : > { %v5991_v30 = vsel %vm2459_vm10, %v2452_v31, %v2374_v51  ;;  %v5994_v9 = vsel %vm2459_vm10, %v2451_v17, %v2372_v36 }
 0x33c   : > { %4076 = vmatprep.mubr.msk.f32.mxu1 %vm2503_vm11, %v5994_v9 }
 0x33d   : > { %4077 = vmatmul.mubr.msk.f32.gmra.mrb[26].mxu1 %vm2503_vm11, %v5991_v30 }
 0x33e   : > { %v2180_v58 = vpop.permute.xlu1 %2179  ;;  %v2178_v7 = vpop.permute.xlu0 %2177 }
 0x33f   : > { %v2454_v25 = vsel %vm281_vm2, %v5728_v21, %v2180_v58  ;;  %v2453_v42 = vsel %vm281_vm2, %v5730_v5, %v2178_v7 }
 0x342   : > { %v2378_v11 = vpop.permute.xlu1 %2377  ;;  %v2376_v32 = vpop.permute.xlu0 %2375 }
 0x343   : > { %v6005_v53 = vsel %vm2459_vm10, %v2454_v25, %v2378_v11  ;;  %v6008_v2 = vsel %vm2459_vm10, %v2453_v42, %v2376_v32 }
 0x344   : > { %4079 = vmatprep.mubr.msk.f32.mxu1 %vm2503_vm11, %v6008_v2 }
 0x345   : > { %4080 = vmatmul.mubr.msk.f32.gmra.mrb[28].mxu1 %vm2503_vm11, %v6005_v53 }
 0x346   : > { %v2184_v38 = vpop.permute.xlu1 %2183  ;;  %v2182_v54 = vpop.permute.xlu0 %2181 }
 0x347   : > { %v2456_v21 = vsel %vm281_vm2, %v5748_v16, %v2184_v38  ;;  %v2455_v5 = vsel %vm281_vm2, %v5750_v24, %v2182_v54  ;;  %v2424_v16 = vsel %vm281_vm2, %v4364_v37, %v5738_v35  ;;  %v2423_v24 = vsel %vm281_vm2, %v4365_v15, %v5740_v27 }
 0x34a   : > { %v2382_v6 = vpop.permute.xlu1 %2381  ;;  %v2380_v26 = vpop.permute.xlu0 %2379 }
 0x34b   : > { %v6019_v50 = vsel %vm2459_vm10, %v2456_v21, %v2382_v6  ;;  %v6022_v46 = vsel %vm2459_vm10, %v2455_v5, %v2380_v26 }
 0x34c   : > { %4082 = vmatprep.mubr.msk.f32.mxu1 %vm2503_vm11, %v6022_v46 }
 0x34d   : > { %4083 = vmatmul.mubr.msk.f32.gmra.mrb[30].mxu1 %vm2503_vm11, %v6019_v50 }
 0x34e   : > { %v2318_v22 = vpop.permute.xlu1 %2317  ;;  %v2316_v48 = vpop.permute.xlu0 %2315 }
 0x34f   : > { %v2461_v28 = vsel %vm2459_vm10, %v2424_v16, %v2318_v22  ;;  %v2460_v47 = vsel %vm2459_vm10, %v2423_v24, %v2316_v48 }
 0x350   : > { %4091 = vmatprep.mubr.msk.f32.mxu1 %vm2503_vm11, %v2460_v47 }
 0x351   : > { %4092 = vmatmul.mubr.msk.f32.vlgmr.msra.gmra.mrb[0].mxu1 %vm2503_vm11, %v2461_v28 }
 0x352   : > { %4222 = vmatpush3.bf16.msra.mxu1 %v5801_v45  ;;  %4094 = vmatprep.mubr.msk.f32.mxu1 %vm2503_vm11, %v5770_v12  ;;  %v2186_v35 = vpop.permute.xlu0 %2185  ;;  %v2188_v27 = vpop.permute.xlu1 %2187 }
 0x353   : > { %4143 = vmatprep.subr.mxu1 %v3630_v62 }
 0x355   : > { %4095 = vmatmul.mubr.msk.f32.gmra.mrb[2].mxu1 %vm2503_vm11, %v5765_v0  ;;  %v2457_v0 = vsel %vm281_vm2, %v5782_v55, %v2186_v35 }
 0x356   : > { %4097 = vmatprep.mubr.msk.f32.mxu1 %vm2503_vm11, %v5813_v61  ;;  %4144 = vmatpush3.msra.mxu1 %v3630_v62  ;;  %v2384_v12 = vpop.permute.xlu0 %2383 }
 0x357   : > { %v2494_v45 = vsel %vm2459_vm10, %v2457_v0, %v2384_v12 }
 0x359   : > { %4098 = vmatmul.mubr.msk.f32.gmra.mrb[4].mxu1 %vm2503_vm11, %v5810_v3 }
 0x35a   : > { %4100 = vmatprep.mubr.msk.f32.mxu1 %vm2503_vm11, %v5838_v14 }
 0x35d   : > { %4101 = vmatmul.mubr.msk.f32.gmra.mrb[6].mxu1 %vm2503_vm11, %v5835_v56 }
 0x35e   : > { %4103 = vmatprep.mubr.msk.f32.mxu1 %vm2503_vm11, %v5854_v34 }
 0x361   : > { %4104 = vmatmul.mubr.msk.f32.gmra.mrb[8].mxu1 %vm2503_vm11, %v5851_v41 }
 0x362   : > { %4106 = vmatprep.mubr.msk.f32.mxu1 %vm2503_vm11, %v5868_v19 }
 0x365   : > { %4107 = vmatmul.mubr.msk.f32.gmra.mrb[10].mxu1 %vm2503_vm11, %v5865_v57 }
 0x366   : > { %4109 = vmatprep.mubr.msk.f32.mxu1 %vm2503_vm11, %v5882_v43 }
 0x369   : > { %4110 = vmatmul.mubr.msk.f32.gmra.mrb[12].mxu1 %vm2503_vm11, %v5879_v20 }
 0x36a   : > { %4112 = vmatprep.mubr.msk.f32.mxu1 %vm2503_vm11, %v5896_v63 }
 0x36d   : > { %4113 = vmatmul.mubr.msk.f32.gmra.mrb[14].mxu1 %vm2503_vm11, %v5893_v8 }
 0x36e   : > { %4115 = vmatprep.mubr.msk.f32.mxu1 %vm2503_vm11, %v5910_v33 }
 0x371   : > { %4116 = vmatmul.mubr.msk.f32.gmra.mrb[16].mxu1 %vm2503_vm11, %v5907_v13 }
 0x372   : > { %4118 = vmatprep.mubr.msk.f32.mxu1 %vm2503_vm11, %v5924_v52 }
 0x375   : > { %4119 = vmatmul.mubr.msk.f32.gmra.mrb[18].mxu1 %vm2503_vm11, %v5921_v59 }
 0x376   : > { %4121 = vmatprep.mubr.msk.f32.mxu1 %vm2503_vm11, %v5938_v10 }
 0x379   : > { %4122 = vmatmul.mubr.msk.f32.gmra.mrb[20].mxu1 %vm2503_vm11, %v5935_v40 }
 0x37a   : > { %4124 = vmatprep.mubr.msk.f32.mxu1 %vm2503_vm11, %v5952_v44 }
 0x37d   : > { %4125 = vmatmul.mubr.msk.f32.gmra.mrb[22].mxu1 %vm2503_vm11, %v5949_v1 }
 0x37e   : > { %4127 = vmatprep.mubr.msk.f32.mxu1 %vm2503_vm11, %v5966_v60 }
 0x381   : > { %4128 = vmatmul.mubr.msk.f32.gmra.mrb[24].mxu1 %vm2503_vm11, %v5963_v4 }
 0x382   : > { %4130 = vmatprep.mubr.msk.f32.mxu1 %vm2503_vm11, %v5980_v39 }
 0x385   : > { %4131 = vmatmul.mubr.msk.f32.gmra.mrb[26].mxu1 %vm2503_vm11, %v5977_v49 }
 0x386   : > { %4133 = vmatprep.mubr.msk.f32.mxu1 %vm2503_vm11, %v5994_v9 }
 0x389   : > { %4134 = vmatmul.mubr.msk.f32.gmra.mrb[28].mxu1 %vm2503_vm11, %v5991_v30 }
 0x38a   : > { %4136 = vmatprep.mubr.msk.f32.mxu1 %vm2503_vm11, %v6008_v2 }
 0x38d   : > { %4137 = vmatmul.mubr.msk.f32.gmra.mrb[30].mxu1 %vm2503_vm11, %v6005_v53 }
 0x38e   : > { %4145 = vmatprep.mubr.msk.f32.mxu1 %vm2503_vm11, %v5813_v61  ;;  %v2386_v61 = vpop.permute.xlu1 %2385 }
 0x391   : > { %4146 = vmatmul.mubr.msk.f32.vlgmr.msra.gmra.mrb[0].mxu1 %vm2503_vm11, %v5810_v3  ;;  %v2458_v3 = vsel %vm281_vm2, %v5784_v29, %v2188_v27 }
 0x392   : > { %4148 = vmatprep.mubr.msk.f32.mxu1 %vm2503_vm11, %v5838_v14  ;;  %v2495_v55 = vsel %vm2459_vm10, %v2458_v3, %v2386_v61 }
 0x395   : > { %4149 = vmatmul.mubr.msk.f32.gmra.mrb[2].mxu1 %vm2503_vm11, %v5835_v56  ;;  %v6171_v56 = vld [vmem:[%s6283_s4] ss:$0 sm:$0xff] }
 0x396   : > { %4151 = vmatprep.mubr.msk.f32.mxu1 %vm2503_vm11, %v5854_v34 }
 0x399   : > { %4152 = vmatmul.mubr.msk.f32.gmra.mrb[4].mxu1 %vm2503_vm11, %v5851_v41 }
 0x39a   : > { %4154 = vmatprep.mubr.msk.f32.mxu1 %vm2503_vm11, %v5868_v19 }
 0x39d   : > { %4155 = vmatmul.mubr.msk.f32.gmra.mrb[6].mxu1 %vm2503_vm11, %v5865_v57 }
 0x39e   : > { %4157 = vmatprep.mubr.msk.f32.mxu1 %vm2503_vm11, %v5882_v43 }
 0x3a1   : > { %4158 = vmatmul.mubr.msk.f32.gmra.mrb[8].mxu1 %vm2503_vm11, %v5879_v20 }
 0x3a2   : > { %4160 = vmatprep.mubr.msk.f32.mxu1 %vm2503_vm11, %v5896_v63 }
 0x3a5   : > { %4161 = vmatmul.mubr.msk.f32.gmra.mrb[10].mxu1 %vm2503_vm11, %v5893_v8 }
 0x3a6   : > { %4163 = vmatprep.mubr.msk.f32.mxu1 %vm2503_vm11, %v5910_v33 }
 0x3a9   : > { %4164 = vmatmul.mubr.msk.f32.gmra.mrb[12].mxu1 %vm2503_vm11, %v5907_v13 }
 0x3aa   : > { %4166 = vmatprep.mubr.msk.f32.mxu1 %vm2503_vm11, %v5924_v52 }
 0x3ad   : > { %4167 = vmatmul.mubr.msk.f32.gmra.mrb[14].mxu1 %vm2503_vm11, %v5921_v59 }
 0x3ae   : > { %4169 = vmatprep.mubr.msk.f32.mxu1 %vm2503_vm11, %v5938_v10 }
 0x3b1   : > { %4170 = vmatmul.mubr.msk.f32.gmra.mrb[16].mxu1 %vm2503_vm11, %v5935_v40 }
 0x3b2   : > { %4172 = vmatprep.mubr.msk.f32.mxu1 %vm2503_vm11, %v5952_v44 }
 0x3b5   : > { %4173 = vmatmul.mubr.msk.f32.gmra.mrb[18].mxu1 %vm2503_vm11, %v5949_v1 }
 0x3b6   : > { %4175 = vmatprep.mubr.msk.f32.mxu1 %vm2503_vm11, %v5966_v60 }
 0x3b9   : > { %4176 = vmatmul.mubr.msk.f32.gmra.mrb[20].mxu1 %vm2503_vm11, %v5963_v4 }
 0x3ba   : > { %4178 = vmatprep.mubr.msk.f32.mxu1 %vm2503_vm11, %v5980_v39 }
 0x3bd   : > { %4179 = vmatmul.mubr.msk.f32.gmra.mrb[22].mxu1 %vm2503_vm11, %v5977_v49 }
 0x3be   : > { %4181 = vmatprep.mubr.msk.f32.mxu1 %vm2503_vm11, %v5994_v9 }
 0x3c1   : > { %4182 = vmatmul.mubr.msk.f32.gmra.mrb[24].mxu1 %vm2503_vm11, %v5991_v30 }
 0x3c2   : > { %4184 = vmatprep.mubr.msk.f32.mxu1 %vm2503_vm11, %v6008_v2 }
 0x3c5   : > { %4185 = vmatmul.mubr.msk.f32.gmra.mrb[26].mxu1 %vm2503_vm11, %v6005_v53 }
 0x3c6   : > { %4187 = vmatprep.mubr.msk.f32.mxu1 %vm2503_vm11, %v6022_v46 }
 0x3c9   : > { %4188 = vmatmul.mubr.msk.f32.gmra.mrb[28].mxu1 %vm2503_vm11, %v6019_v50 }
 0x3ca   : > { %4190 = vmatprep.mubr.msk.f32.mxu1 %vm2503_vm11, %v2494_v45 }
 0x3cd   : > { %4191 = vmatmul.mubr.msk.f32.gmra.mrb[30].mxu1 %vm2503_vm11, %v2495_v55 }
 0x464   : > { %v4147_v29 = vpop.f32.mrb[0].mxu1 }
 0x465   : > { %v3330_v14 = vadd.f32 %v4147_v29, %v6171_v56  ;;  %v3132_v41 = vpop.f32.mrb[1].mxu1 }
 0x466   : > { %v3329_v34 = vadd.f32 %v6171_v56, %v3132_v41 }
 0x467   : > { %3362 = vst.msk [vmem:[%s6178_s17 + $0x8] sm:$0xff] %vm225_vm0, %v3330_v14 }
 0x468   : > { %3361 = vst.msk [vmem:[%s6178_s17] sm:$0xff] %vm225_vm0, %v3329_v34  ;;  %v4150_v57 = vpop.f32.mrb[2].mxu1 }
 0x469   : > { %v3332_v19 = vadd.f32 %v4150_v57, %v6171_v56  ;;  %v3142_v20 = vpop.f32.mrb[3].mxu1 }
 0x46a   : > { %v3331_v43 = vadd.f32 %v6171_v56, %v3142_v20 }
 0x46b   : > { %3364 = vst.msk [vmem:[%s6178_s17 + $0x18] sm:$0xff] %vm225_vm0, %v3332_v19 }
 0x46c   : > { %3363 = vst.msk [vmem:[%s6178_s17 + $0x10] sm:$0xff] %vm225_vm0, %v3331_v43  ;;  %v4153_v8 = vpop.f32.mrb[4].mxu1 }
 0x46d   : > { %v3334_v63 = vadd.f32 %v4153_v8, %v6171_v56  ;;  %v3152_v13 = vpop.f32.mrb[5].mxu1 }
 0x46e   : > { %v3333_v33 = vadd.f32 %v6171_v56, %v3152_v13 }
 0x46f   : > { %3366 = vst.msk [vmem:[%s6178_s17 + $0x28] sm:$0xff] %vm225_vm0, %v3334_v63 }
 0x470   : > { %3365 = vst.msk [vmem:[%s6178_s17 + $0x20] sm:$0xff] %vm225_vm0, %v3333_v33  ;;  %v4156_v59 = vpop.f32.mrb[6].mxu1 }
 0x471   : > { %v3336_v52 = vadd.f32 %v4156_v59, %v6171_v56  ;;  %v3162_v40 = vpop.f32.mrb[7].mxu1 }
 0x472   : > { %v3335_v10 = vadd.f32 %v6171_v56, %v3162_v40 }
 0x473   : > { %3368 = vst.msk [vmem:[%s6178_s17 + $0x38] sm:$0xff] %vm225_vm0, %v3336_v52 }
 0x474   : > { %3367 = vst.msk [vmem:[%s6178_s17 + $0x30] sm:$0xff] %vm225_vm0, %v3335_v10  ;;  %v4159_v1 = vpop.f32.mrb[8].mxu1 }
 0x475   : > { %v3338_v44 = vadd.f32 %v4159_v1, %v6171_v56  ;;  %v3172_v4 = vpop.f32.mrb[9].mxu1 }
 0x476   : > { %v3337_v60 = vadd.f32 %v6171_v56, %v3172_v4 }
 0x477   : > { %3370 = vst.msk [vmem:[%s6178_s17 + $0x48] sm:$0xff] %vm225_vm0, %v3338_v44 }
 0x478   : > { %3369 = vst.msk [vmem:[%s6178_s17 + $0x40] sm:$0xff] %vm225_vm0, %v3337_v60  ;;  %v4162_v49 = vpop.f32.mrb[10].mxu1 }
 0x479   : > { %v3340_v39 = vadd.f32 %v4162_v49, %v6171_v56  ;;  %v3182_v23 = vpop.f32.mrb[11].mxu1 }
 0x47a   : > { %v3339_v18 = vadd.f32 %v6171_v56, %v3182_v23 }
 0x47b   : > { %3372 = vst.msk [vmem:[%s6178_s17 + $0x58] sm:$0xff] %vm225_vm0, %v3340_v39 }
 0x47c   : > { %3371 = vst.msk [vmem:[%s6178_s17 + $0x50] sm:$0xff] %vm225_vm0, %v3339_v18  ;;  %v4165_v31 = vpop.f32.mrb[12].mxu1 }
 0x47d   : > { %v3342_v17 = vadd.f32 %v4165_v31, %v6171_v56  ;;  %v3192_v51 = vpop.f32.mrb[13].mxu1 }
 0x47e   : > { %v3341_v36 = vadd.f32 %v6171_v56, %v3192_v51 }
 0x47f   : > { %3374 = vst.msk [vmem:[%s6178_s17 + $0x68] sm:$0xff] %vm225_vm0, %v3342_v17 }
 0x480   : > { %3373 = vst.msk [vmem:[%s6178_s17 + $0x60] sm:$0xff] %vm225_vm0, %v3341_v36  ;;  %v4168_v30 = vpop.f32.mrb[14].mxu1 }
 0x481   : > { %v3344_v9 = vadd.f32 %v4168_v30, %v6171_v56  ;;  %v3202_v58 = vpop.f32.mrb[15].mxu1 }
 0x482   : > { %v3343_v7 = vadd.f32 %v6171_v56, %v3202_v58 }
 0x483   : > { %3376 = vst.msk [vmem:[%s6178_s17 + $0x78] sm:$0xff] %vm225_vm0, %v3344_v9 }
 0x484   : > { %3375 = vst.msk [vmem:[%s6178_s17 + $0x70] sm:$0xff] %vm225_vm0, %v3343_v7  ;;  %v4171_v25 = vpop.f32.mrb[16].mxu1 }
 0x485   : > { %v3346_v42 = vadd.f32 %v4171_v25, %v6171_v56  ;;  %v3212_v11 = vpop.f32.mrb[17].mxu1 }
 0x486   : > { %v3345_v32 = vadd.f32 %v6171_v56, %v3212_v11 }
 0x487   : > { %3378 = vst.msk [vmem:[%s6178_s17 + $0x88] sm:$0xff] %vm225_vm0, %v3346_v42 }
 0x488   : > { %3377 = vst.msk [vmem:[%s6178_s17 + $0x80] sm:$0xff] %vm225_vm0, %v3345_v32  ;;  %v4174_v53 = vpop.f32.mrb[18].mxu1 }
 0x489   : > { %v3348_v2 = vadd.f32 %v4174_v53, %v6171_v56  ;;  %v3222_v38 = vpop.f32.mrb[19].mxu1 }
 0x48a   : > { %v3347_v54 = vadd.f32 %v6171_v56, %v3222_v38 }
 0x48b   : > { %3380 = vst.msk [vmem:[%s6178_s17 + $0x98] sm:$0xff] %vm225_vm0, %v3348_v2 }
 0x48c   : > { %3379 = vst.msk [vmem:[%s6178_s17 + $0x90] sm:$0xff] %vm225_vm0, %v3347_v54  ;;  %v4177_v21 = vpop.f32.mrb[20].mxu1 }
 0x48d   : > { %v3350_v5 = vadd.f32 %v4177_v21, %v6171_v56  ;;  %v3232_v6 = vpop.f32.mrb[21].mxu1 }
 0x48e   : > { %v3349_v26 = vadd.f32 %v6171_v56, %v3232_v6 }
 0x48f   : > { %3382 = vst.msk [vmem:[%s6178_s17 + $0xa8] sm:$0xff] %vm225_vm0, %v3350_v5 }
 0x490   : > { %3381 = vst.msk [vmem:[%s6178_s17 + $0xa0] sm:$0xff] %vm225_vm0, %v3349_v26  ;;  %v4180_v50 = vpop.f32.mrb[22].mxu1 }
 0x491   : > { %v3352_v46 = vadd.f32 %v4180_v50, %v6171_v56  ;;  %v3242_v37 = vpop.f32.mrb[23].mxu1 }
 0x492   : > { %v3351_v16 = vadd.f32 %v6171_v56, %v3242_v37 }
 0x493   : > { %3384 = vst.msk [vmem:[%s6178_s17 + $0xb8] sm:$0xff] %vm225_vm0, %v3352_v46 }
 0x494   : > { %3383 = vst.msk [vmem:[%s6178_s17 + $0xb0] sm:$0xff] %vm225_vm0, %v3351_v16  ;;  %v4183_v15 = vpop.f32.mrb[24].mxu1 }
 0x495   : > { %v3354_v24 = vadd.f32 %v4183_v15, %v6171_v56  ;;  %v3252_v22 = vpop.f32.mrb[25].mxu1 }
 0x496   : > { %v3353_v48 = vadd.f32 %v6171_v56, %v3252_v22 }
 0x497   : > { %3386 = vst.msk [vmem:[%s6178_s17 + $0xc8] sm:$0xff] %vm225_vm0, %v3354_v24 }
 0x498   : > { %3385 = vst.msk [vmem:[%s6178_s17 + $0xc0] sm:$0xff] %vm225_vm0, %v3353_v48  ;;  %v4186_v28 = vpop.f32.mrb[26].mxu1 }
 0x499   : > { %v3356_v47 = vadd.f32 %v4186_v28, %v6171_v56  ;;  %v3262_v62 = vpop.f32.mrb[27].mxu1 }
 0x49a   : > { %v3355_v35 = vadd.f32 %v6171_v56, %v3262_v62 }
 0x49b   : > { %3388 = vst.msk [vmem:[%s6178_s17 + $0xd8] sm:$0xff] %vm225_vm0, %v3356_v47 }
 0x49c   : > { %3387 = vst.msk [vmem:[%s6178_s17 + $0xd0] sm:$0xff] %vm225_vm0, %v3355_v35  ;;  %v4189_v27 = vpop.f32.mrb[28].mxu1 }
 0x49d   : > { %v3358_v0 = vadd.f32 %v4189_v27, %v6171_v56  ;;  %v3272_v12 = vpop.f32.mrb[29].mxu1 }
 0x49e   : > { %v3357_v45 = vadd.f32 %v6171_v56, %v3272_v12 }
 0x49f   : > { %3390 = vst.msk [vmem:[%s6178_s17 + $0xe8] sm:$0xff] %vm225_vm0, %v3358_v0 }
 0x4a0   : > { %3389 = vst.msk [vmem:[%s6178_s17 + $0xe0] sm:$0xff] %vm225_vm0, %v3357_v45  ;;  %v4192_v3 = vpop.f32.mrb[30].mxu1 }
 0x4a1   : > { %v3360_v61 = vadd.f32 %v4192_v3, %v6171_v56  ;;  %v3282_v55 = vpop.f32.mrb[31].mxu1 }
 0x4a2   : > { %v3359_v29 = vadd.f32 %v6171_v56, %v3282_v55 }
 0x4a3   : > { %3392 = vst.msk [vmem:[%s6178_s17 + $0xf8] sm:$0xff] %vm225_vm0, %v3360_v61 }
 0x4a4   : > { %3391 = vst.msk [vmem:[%s6178_s17 + $0xf0] sm:$0xff] %vm225_vm0, %v3359_v29 }
 0x4a5 PF: > { %s15_s18 = sadd.s32 1, %s4372_s18  }
 0x4a6   : > { %p12_p4 = scmp.ge.s32.totalorder %s15_s18, 4  }
 0x4a8   :  { %14 = sbr.rel (!%p12_p4) target bundleno = 1 (0x1), region = 76 }

</bundles_post_ra>
